<compile_context>
chip_gen: v6e
topology: v6e:2x2x1
jax: 0.10.0
libtpu: 0.0.40
codegen_flags: <defaults>
</compile_context>

<pallas_src>
import jax
import jax.numpy as jnp
from jax import lax
from jax.experimental import pallas as pl
from jax.experimental.pallas import tpu as pltpu

EPS = 1e-5
F_IN = 60          # logical feature width of x / o2 / o3
F_PAD = 128        # lane-padded feature width
H = 256            # hidden width

# ---- packed bf16 weight slab layout (SLAB_ROWS x 256), all offsets (8,128)-aligned ----
_R_ENC = 0         # rows [  0,128): Encoder Linear(60,256)      (rows 60..127 zero)
_R_P1 = 128        # rows [128,384): Project Linear(256,256)
_R_Q1 = 384        # rows [384,512): Prediction Linear(60,256)   (rows 60..127 zero)
_R_P2Q2 = 512      # rows [512,768): cols [0,128)  Project Linear(256,60)    (cols 60..127 zero)
                   #                 cols [128,256) Prediction Linear(256,60) (cols 60..127 zero)
SLAB_ROWS = 768

# ---- packed f32 per-feature vector slab rows (16 x 256) ----
_ROW_B_ENC, _ROW_G1, _ROW_BE1, _ROW_B_P1, _ROW_B_P2 = 0, 1, 2, 3, 4
_ROW_B_Q1, _ROW_G2, _ROW_BE2, _ROW_B_Q2 = 5, 6, 7, 8
_VEC_ROWS = 16


def online_model_kernel(
    x_ref,                       # (TM, 60)  f32   batch tile of x (streamed, phase 0)
    w_ref,                       # (768,256) bf16  packed weight slab (resident)
    vec_ref,                     # (16, 256) f32   packed biases / BN affine (resident)
    o1_ref,                      # (TM, 256) f32   output tile (written in phase 0)
    o3_ref,                      # (TM, 128) f32   output tile (written in phase 2)
    o1_buf,                      # (B, 256)  f32   full-batch o1 staging
    h2_buf,                      # (B, 256)  f32   full-batch pre-BN2 staging
    xpad_buf,                    # (TM, 128) f32   lane-padding scratch for x
    acc1,                        # (2, 256)  f32   BN1 sum / sum-of-squares accumulator
    acc2,                        # (2, 256)  f32   BN2 sum / sum-of-squares accumulator
    coef1,                       # (2, 256)  f32   BN1 folded scale / shift
    coef2,                       # (2, 256)  f32   BN2 folded scale / shift
):
    ph = pl.program_id(0)        # 0: encoder + BN1 stats, 1: project + q1 + BN2 stats, 2: BN2 + q2
    t = pl.program_id(1)
    tm = x_ref.shape[0]
    batch = o1_buf.shape[0]
    inv_b = 1.0 / batch          # static python float (full-batch statistics)
    row0 = pl.multiple_of(t * tm, tm)

    vecs = vec_ref[...]          # one small resident slab, static row slices
    b_enc = vecs[_ROW_B_ENC:_ROW_B_ENC + 1, :]
    g1 = vecs[_ROW_G1:_ROW_G1 + 1, :]
    be1 = vecs[_ROW_BE1:_ROW_BE1 + 1, :]
    b_p1 = vecs[_ROW_B_P1:_ROW_B_P1 + 1, :]
    b_p2 = vecs[_ROW_B_P2:_ROW_B_P2 + 1, :F_PAD]
    b_q1 = vecs[_ROW_B_Q1:_ROW_B_Q1 + 1, :]
    g2 = vecs[_ROW_G2:_ROW_G2 + 1, :]
    be2 = vecs[_ROW_BE2:_ROW_BE2 + 1, :]
    b_q2 = vecs[_ROW_B_Q2:_ROW_B_Q2 + 1, :F_PAD]

    # ------------- phase 0: o1 = Encoder(x); accumulate BN1 batch sums -------------
    @pl.when(ph == 0)
    def _phase0():
        # lane-pad x (60 -> 128) and cast to bf16 inside the kernel (no HBM round trip)
        xpad_buf[...] = jnp.zeros_like(xpad_buf)
        xpad_buf[:, 0:F_IN] = x_ref[...]
        xp = xpad_buf[...].astype(jnp.bfloat16)

        w_enc = w_ref[_R_ENC:_R_ENC + F_PAD, :]
        o1 = jnp.dot(xp, w_enc, preferred_element_type=jnp.float32) + b_enc
        o1_ref[...] = o1
        o1_buf[pl.ds(row0, tm), :] = o1

        @pl.when(t == 0)
        def _():
            acc1[...] = jnp.zeros_like(acc1)
        acc1[0:1, :] += jnp.sum(o1, axis=0, keepdims=True)
        acc1[1:2, :] += jnp.sum(o1 * o1, axis=0, keepdims=True)

    # --- phase 1: BN1 -> ReLU -> Linear -> ReLU -> [Dropout] -> Linear -> Linear(q1);
    #              accumulate BN2 batch sums ---
    @pl.when(ph == 1)
    def _phase1():
        @pl.when(t == 0)
        def _():
            mu = acc1[0:1, :] * inv_b
            var = jnp.maximum(acc1[1:2, :] * inv_b - mu * mu, 0.0)
            rstd = lax.rsqrt(var + EPS)
            coef1[0:1, :] = g1 * rstd                       # folded scale
            coef1[1:2, :] = be1 - mu * g1 * rstd            # folded shift
            acc2[...] = jnp.zeros_like(acc2)

        o1 = o1_buf[pl.ds(row0, tm), :]
        h = jnp.maximum(o1 * coef1[0:1, :] + coef1[1:2, :], 0.0)      # BN1 + ReLU (f32)
        w_p1 = w_ref[_R_P1:_R_P1 + H, :]
        h = jnp.dot(h.astype(jnp.bfloat16), w_p1,
                    preferred_element_type=jnp.float32) + b_p1
        h = jnp.maximum(h, 0.0)                                       # ReLU (f32)
        # TODO(synk): Dropout(0.4) left as identity (eval semantics).
        w_p2 = w_ref[_R_P2Q2:_R_P2Q2 + H, 0:F_PAD]
        o2 = jnp.dot(h.astype(jnp.bfloat16), w_p2,
                     preferred_element_type=jnp.float32) + b_p2       # (TM,128), pad lanes = 0
        w_q1 = w_ref[_R_Q1:_R_Q1 + F_PAD, :]
        h2 = jnp.dot(o2.astype(jnp.bfloat16), w_q1,
                     preferred_element_type=jnp.float32) + b_q1       # (TM,256)
        h2_buf[pl.ds(row0, tm), :] = h2
        acc2[0:1, :] += jnp.sum(h2, axis=0, keepdims=True)
        acc2[1:2, :] += jnp.sum(h2 * h2, axis=0, keepdims=True)

    # ------------------- phase 2: BN2 -> ReLU -> Linear(q2) -> o3 -------------------
    @pl.when(ph == 2)
    def _phase2():
        @pl.when(t == 0)
        def _():
            mu = acc2[0:1, :] * inv_b
            var = jnp.maximum(acc2[1:2, :] * inv_b - mu * mu, 0.0)
            rstd = lax.rsqrt(var + EPS)
            coef2[0:1, :] = g2 * rstd
            coef2[1:2, :] = be2 - mu * g2 * rstd

        h2 = h2_buf[pl.ds(row0, tm), :]
        h2 = jnp.maximum(h2 * coef2[0:1, :] + coef2[1:2, :], 0.0)     # BN2 + ReLU (f32)
        w_q2 = w_ref[_R_P2Q2:_R_P2Q2 + H, F_PAD:2 * F_PAD]
        o3_ref[...] = jnp.dot(h2.astype(jnp.bfloat16), w_q2,
                              preferred_element_type=jnp.float32) + b_q2


def online_model_forward(x, kp, tm=None):
    """Whole Online_model forward in one Pallas kernel call.

    x : (B, 60) f32, B must be a multiple of 16 (bf16 vreg packing).
    kp: packed kernel params from pack_params().
    tm: batch-tile rows (default: largest power-of-two divisor of B up to 256;
        use 128 on v5e, 256 on v6e/v7x).
    Returns (o1 (B,256) f32, o3 (B,60) f32).
    """
    batch, f = x.shape
    assert f == F_IN
    assert batch % 16 == 0, "batch must be a multiple of 16 (bf16 sublane packing)"
    if tm is None:
        tm = 256
        while batch % tm != 0:
            tm //= 2
    assert tm % 16 == 0 and batch % tm == 0
    nt = batch // tm

    w, vecs = kp["w"], kp["vecs"]

    # x streams in during phase 0, then its block index freezes -> no re-DMA.
    def x_map(ph, t):
        return (jnp.maximum(t - ph * nt, 0), 0)

    # weight / vector slabs: constant block index -> one DMA, resident for the grid.
    def const_map(ph, t):
        return (0, 0)

    # o1 is written tile-by-tile in phase 0 only; afterwards its block index freezes at
    # the last tile so no stale writebacks clobber it (final flush rewrites identical data).
    def o1_map(ph, t):
        return (jnp.minimum(t + ph * nt, nt - 1), 0)

    # o3 is only written in phase 2; before that its block index is frozen at 0 so no
    # garbage writebacks happen.
    def o3_map(ph, t):
        return (jnp.maximum(t - (2 - ph) * nt, 0), 0)

    flops = 2 * batch * (F_PAD * H + H * H + H * F_PAD + F_PAD * H + H * F_PAD)
    bytes_accessed = (x.size * 4 + w.size * 2 + vecs.size * 4
                      + batch * H * 4 + batch * F_PAD * 4)
    cost = pl.CostEstimate(flops=flops, transcendentals=2 * H,
                           bytes_accessed=bytes_accessed)

    # VMEM budget: resident slabs (x2 for buffering), double-buffered tile blocks,
    # full-batch o1/h2 staging, BN scratch, plus margin.  Clamped to v7x's 64 MiB.
    vmem_bytes = (2 * w.size * 2 + 2 * vecs.size * 4
                  + 2 * tm * (F_IN * 4 + H * 4 + F_PAD * 4) + tm * F_PAD * 4
                  + 2 * batch * H * 4 + 8 * H * 4
                  + (2 << 20))
    vmem_bytes = int(min(max(vmem_bytes, 4 << 20), 64 * 1024 * 1024))

    o1, o3_pad = pl.pallas_call(
        online_model_kernel,
        grid=(3, nt),
        in_specs=[
            pl.BlockSpec((tm, F_IN), x_map),
            pl.BlockSpec((SLAB_ROWS, H), const_map),
            pl.BlockSpec((_VEC_ROWS, H), const_map),
        ],
        out_specs=(
            pl.BlockSpec((tm, H), o1_map),
            pl.BlockSpec((tm, F_PAD), o3_map),
        ),
        out_shape=(
            jax.ShapeDtypeStruct((batch, H), jnp.float32),
            jax.ShapeDtypeStruct((batch, F_PAD), jnp.float32),
        ),
        scratch_shapes=[
            pltpu.VMEM((batch, H), jnp.float32),   # o1 staging (full batch)
            pltpu.VMEM((batch, H), jnp.float32),   # h2 staging (full batch)
            pltpu.VMEM((tm, F_PAD), jnp.float32),  # x lane-padding scratch
            pltpu.VMEM((2, H), jnp.float32),       # BN1 sum / sum-sq accumulator
            pltpu.VMEM((2, H), jnp.float32),       # BN2 sum / sum-sq accumulator
            pltpu.VMEM((2, H), jnp.float32),       # BN1 folded scale / shift
            pltpu.VMEM((2, H), jnp.float32),       # BN2 folded scale / shift
        ],
        compiler_params=pltpu.CompilerParams(
            # Both axes sequential: BN sums accumulate in scratch across batch tiles.
            # TODO(synk): v7x dual-TC needs a cross-core stats reduction before the
            #             tile axis can be "parallel".
            dimension_semantics=("arbitrary", "arbitrary"),
            vmem_limit_bytes=vmem_bytes),
        cost_estimate=cost,
    )(x, w, vecs)
    # keep o3 lane-dense in the kernel; slice back to the logical 60 features here.
    return o1, o3_pad[:, :F_IN]


def init_params(key):
    """Deterministic synthetic parameters at their logical (PyTorch) shapes."""
    ks = jax.random.split(key, 6)

    def lin(k, fan_in, fan_out):
        w = jax.random.normal(k, (fan_in, fan_out), jnp.float32) * (1.0 / jnp.sqrt(fan_in))
        b = jnp.full((1, fan_out), 0.01, jnp.float32)
        return w, b

    w_enc, b_enc = lin(ks[0], F_IN, H)     # placeholder Encoder Linear(60,256)
    w_p1, b_p1 = lin(ks[1], H, H)          # Project.Linear(256,256)
    w_p2, b_p2 = lin(ks[2], H, F_IN)       # Project.Linear(256,60)
    w_q1, b_q1 = lin(ks[3], F_IN, H)       # Prediction.Linear(60,256)
    w_q2, b_q2 = lin(ks[4], H, F_IN)       # Prediction.Linear(256,60)

    g1 = jnp.ones((1, H), jnp.float32)     # BatchNorm1d defaults: gamma=1, beta=0
    be1 = jnp.zeros((1, H), jnp.float32)
    g2 = jnp.ones((1, H), jnp.float32)
    be2 = jnp.zeros((1, H), jnp.float32)

    return dict(
        w_enc=w_enc, b_enc=b_enc, g1=g1, be1=be1,
        w_p1=w_p1, b_p1=b_p1, w_p2=w_p2, b_p2=b_p2,
        w_q1=w_q1, b_q1=b_q1, g2=g2, be2=be2, w_q2=w_q2, b_q2=b_q2,
    )


def pack_params(p):
    """Pack ALL weights into one (768,256) bf16 slab (one DMA) with 60-wide dims
    zero-padded to 128 lanes, and the nine tiny per-feature vectors into one
    (16,256) f32 slab (one DMA)."""
    slab = jnp.zeros((SLAB_ROWS, H), jnp.float32)
    slab = slab.at[_R_ENC:_R_ENC + F_IN, :].set(p["w_enc"])
    slab = slab.at[_R_P1:_R_P1 + H, :].set(p["w_p1"])
    slab = slab.at[_R_Q1:_R_Q1 + F_IN, :].set(p["w_q1"])
    slab = slab.at[_R_P2Q2:_R_P2Q2 + H, 0:F_IN].set(p["w_p2"])
    slab = slab.at[_R_P2Q2:_R_P2Q2 + H, F_PAD:F_PAD + F_IN].set(p["w_q2"])
    slab = slab.astype(jnp.bfloat16)

    vecs = jnp.zeros((_VEC_ROWS, H), jnp.float32)
    row_defs = [
        (_ROW_B_ENC, "b_enc"), (_ROW_G1, "g1"), (_ROW_BE1, "be1"), (_ROW_B_P1, "b_p1"),
        (_ROW_B_P2, "b_p2"), (_ROW_B_Q1, "b_q1"), (_ROW_G2, "g2"), (_ROW_BE2, "be2"),
        (_ROW_B_Q2, "b_q2"),
    ]
    for row, name in row_defs:
        v = p[name].reshape(-1)
        vecs = vecs.at[row, : v.shape[0]].set(v)

    return dict(w=slab, vecs=vecs)


def reference_forward(x, p):
    """Pure-JAX reference mirroring the kernel's bf16 matmul-input casts (BN/ReLU math
    in f32), so the correctness check validates the Pallas implementation tightly."""
    bf = jnp.bfloat16
    f32 = jnp.float32

    o1 = jnp.dot(x.astype(bf), p["w_enc"].astype(bf), preferred_element_type=f32) + p["b_enc"]
    mu1 = jnp.mean(o1, axis=0, keepdims=True)
    var1 = jnp.mean((o1 - mu1) ** 2, axis=0, keepdims=True)
    h = (o1 - mu1) / jnp.sqrt(var1 + EPS) * p["g1"] + p["be1"]
    h = jnp.maximum(h, 0.0)
    h = jnp.dot(h.astype(bf), p["w_p1"].astype(bf), preferred_element_type=f32) + p["b_p1"]
    h = jnp.maximum(h, 0.0)
    o2 = jnp.dot(h.astype(bf), p["w_p2"].astype(bf), preferred_element_type=f32) + p["b_p2"]

    h2 = jnp.dot(o2.astype(bf), p["w_q1"].astype(bf), preferred_element_type=f32) + p["b_q1"]
    mu2 = jnp.mean(h2, axis=0, keepdims=True)
    var2 = jnp.mean((h2 - mu2) ** 2, axis=0, keepdims=True)
    h2 = (h2 - mu2) / jnp.sqrt(var2 + EPS) * p["g2"] + p["be2"]
    h2 = jnp.maximum(h2, 0.0)
    o3 = jnp.dot(h2.astype(bf), p["w_q2"].astype(bf), preferred_element_type=f32) + p["b_q2"]
    return o1, o3


if __name__ == "__main__":
    key = jax.random.PRNGKey(0)
    k_x, k_p = jax.random.split(key)

    # Small demo shapes; tm=32 gives two batch tiles so the (phase, tile) grid and
    # full-batch BN accumulation across tiles are actually exercised.
    B = 64
    x = jax.random.normal(k_x, (B, F_IN), jnp.float32)   # (batch, features)

    params = init_params(k_p)
    kparams = pack_params(params)

    o1, o3 = online_model_forward(x, kparams, tm=32)
    jax.block_until_ready((o1, o3))

    r1, r3 = reference_forward(x, params)
    assert o1.shape == (B, H) and o3.shape == (B, F_IN)
    assert jnp.allclose(o1, r1, atol=2e-3, rtol=2e-3)
    assert jnp.allclose(o3, r3, atol=2e-3, rtol=2e-3)

    print("KERNEL_OK")
</pallas_src>

<mosaic_0001>
module attributes {stable_mosaic.version = 11 : i64} {
  func.func @online_model_kernel(%arg0: i32, %arg1: i32, %arg2: memref<32x60xf32, #tpu.memory_space<vmem>>, %arg3: memref<768x256xbf16, #tpu.memory_space<vmem>>, %arg4: memref<16x256xf32, #tpu.memory_space<vmem>>, %arg5: memref<32x256xf32, #tpu.memory_space<vmem>>, %arg6: memref<32x128xf32, #tpu.memory_space<vmem>>, %arg7: memref<64x256xf32, #tpu.memory_space<vmem>>, %arg8: memref<64x256xf32, #tpu.memory_space<vmem>>, %arg9: memref<32x128xf32, #tpu.memory_space<vmem>>, %arg10: memref<2x256xf32, #tpu.memory_space<vmem>>, %arg11: memref<2x256xf32, #tpu.memory_space<vmem>>, %arg12: memref<2x256xf32, #tpu.memory_space<vmem>>, %arg13: memref<2x256xf32, #tpu.memory_space<vmem>>) attributes {dimension_semantics = [#tpu.dimension_semantics<arbitrary>, #tpu.dimension_semantics<arbitrary>], iteration_bounds = array<i64: 3, 2>, scalar_prefetch = 0 : i64, scratch_operands = 7 : i64, tpu.core_type = #tpu.core_type<tc>, window_params = [{transform_indices = @transform_0, window_bounds = array<i64: 32, 60>}, {pipeline_mode = #tpu.pipeline_mode<synchronous>, transform_indices = @transform_1, window_bounds = array<i64: 768, 256>}, {pipeline_mode = #tpu.pipeline_mode<synchronous>, transform_indices = @transform_2, window_bounds = array<i64: 16, 256>}, {transform_indices = @transform_3, window_bounds = array<i64: 32, 256>}, {transform_indices = @transform_4, window_bounds = array<i64: 32, 128>}]} {
    %c32_i32 = arith.constant 32 : i32
    %0 = arith.muli %arg1, %c32_i32 : i32
    %1 = tpu.assume_multiple %0, 32 : i32
    %c0 = arith.constant 0 : index
    %c0_0 = arith.constant 0 : index
    %2 = vector.load %arg4[%c0, %c0_0] : memref<16x256xf32, #tpu.memory_space<vmem>>, vector<16x256xf32>
    %3 = vector.extract_strided_slice %2 {offsets = [0, 0], sizes = [1, 256], strides = [1, 1]} : vector<16x256xf32> to vector<1x256xf32>
    %4 = vector.extract_strided_slice %2 {offsets = [1, 0], sizes = [1, 256], strides = [1, 1]} : vector<16x256xf32> to vector<1x256xf32>
    %5 = vector.extract_strided_slice %2 {offsets = [2, 0], sizes = [1, 256], strides = [1, 1]} : vector<16x256xf32> to vector<1x256xf32>
    %6 = vector.extract_strided_slice %2 {offsets = [3, 0], sizes = [1, 256], strides = [1, 1]} : vector<16x256xf32> to vector<1x256xf32>
    %7 = vector.extract_strided_slice %2 {offsets = [4, 0], sizes = [1, 128], strides = [1, 1]} : vector<16x256xf32> to vector<1x128xf32>
    %8 = vector.extract_strided_slice %2 {offsets = [5, 0], sizes = [1, 256], strides = [1, 1]} : vector<16x256xf32> to vector<1x256xf32>
    %9 = vector.extract_strided_slice %2 {offsets = [6, 0], sizes = [1, 256], strides = [1, 1]} : vector<16x256xf32> to vector<1x256xf32>
    %10 = vector.extract_strided_slice %2 {offsets = [7, 0], sizes = [1, 256], strides = [1, 1]} : vector<16x256xf32> to vector<1x256xf32>
    %11 = vector.extract_strided_slice %2 {offsets = [8, 0], sizes = [1, 128], strides = [1, 1]} : vector<16x256xf32> to vector<1x128xf32>
    %c0_i32 = arith.constant 0 : i32
    %12 = arith.cmpi eq, %arg0, %c0_i32 : i32
    %13 = arith.extui %12 : i1 to i32
    %c0_i32_1 = arith.constant 0 : i32
    %14 = arith.cmpi ne, %13, %c0_i32_1 : i32
    scf.if %14 {
      %cst = arith.constant 0.000000e+00 : f32
      %21 = vector.broadcast %cst : f32 to vector<32x128xf32>
      %c0_4 = arith.constant 0 : index
      %c0_5 = arith.constant 0 : index
      %22 = vector.load %arg9[%c0_4, %c0_5] : memref<32x128xf32, #tpu.memory_space<vmem>>, vector<32x128xf32>
      tpu.vector_store %arg9[%c0_4, %c0_5], %21 {strides = array<i32>} : memref<32x128xf32, #tpu.memory_space<vmem>>, vector<32x128xf32>,
      %c0_6 = arith.constant 0 : index
      %c0_7 = arith.constant 0 : index
      %23 = vector.load %arg2[%c0_6, %c0_7] : memref<32x60xf32, #tpu.memory_space<vmem>>, vector<32x60xf32>
      %c0_8 = arith.constant 0 : index
      %c0_9 = arith.constant 0 : index
      %24 = vector.load %arg9[%c0_8, %c0_9] : memref<32x128xf32, #tpu.memory_space<vmem>>, vector<32x60xf32>
      tpu.vector_store %arg9[%c0_8, %c0_9], %23 {strides = array<i32>} : memref<32x128xf32, #tpu.memory_space<vmem>>, vector<32x60xf32>,
      %c0_10 = arith.constant 0 : index
      %c0_11 = arith.constant 0 : index
      %25 = vector.load %arg9[%c0_10, %c0_11] : memref<32x128xf32, #tpu.memory_space<vmem>>, vector<32x128xf32>
      %26 = arith.truncf %25 : vector<32x128xf32> to vector<32x128xbf16>
      %c0_12 = arith.constant 0 : index
      %c0_13 = arith.constant 0 : index
      %27 = vector.load %arg3[%c0_12, %c0_13] : memref<768x256xbf16, #tpu.memory_space<vmem>>, vector<128x256xbf16>
      %cst_14 = arith.constant dense<0.000000e+00> : vector<32x256xf32>
      %28 = tpu.matmul %26, %27, %cst_14 {dimension_numbers = #tpu.dot_dimension_numbers<[1], [0], [0], [1], [0, 0, 1, 1], [], []>} : vector<32x128xbf16>, vector<128x256xbf16>, vector<32x256xf32> -> vector<32x256xf32>
      %29 = vector.broadcast %3 : vector<1x256xf32> to vector<32x256xf32>
      %30 = arith.addf %28, %29 : vector<32x256xf32>
      %c0_15 = arith.constant 0 : index
      %c0_16 = arith.constant 0 : index
      %31 = vector.load %arg5[%c0_15, %c0_16] : memref<32x256xf32, #tpu.memory_space<vmem>>, vector<32x256xf32>
      tpu.vector_store %arg5[%c0_15, %c0_16], %30 {strides = array<i32>} : memref<32x256xf32, #tpu.memory_space<vmem>>, vector<32x256xf32>,
      %32 = arith.index_cast %1 : i32 to index
      %c0_17 = arith.constant 0 : index
      %33 = vector.load %arg7[%32, %c0_17] : memref<64x256xf32, #tpu.memory_space<vmem>>, vector<32x256xf32>
      tpu.vector_store %arg7[%32, %c0_17], %30 {strides = array<i32>} : memref<64x256xf32, #tpu.memory_space<vmem>>, vector<32x256xf32>,
      %c0_i32_18 = arith.constant 0 : i32
      %34 = arith.cmpi eq, %arg1, %c0_i32_18 : i32
      %35 = arith.extui %34 : i1 to i32
      %c0_i32_19 = arith.constant 0 : i32
      %36 = arith.cmpi ne, %35, %c0_i32_19 : i32
      scf.if %36 {
        %cst_29 = arith.constant 0.000000e+00 : f32
        %48 = vector.broadcast %cst_29 : f32 to vector<2x256xf32>
        %c0_30 = arith.constant 0 : index
        %c0_31 = arith.constant 0 : index
        %49 = vector.load %arg10[%c0_30, %c0_31] : memref<2x256xf32, #tpu.memory_space<vmem>>, vector<2x256xf32>
        tpu.vector_store %arg10[%c0_30, %c0_31], %48 {strides = array<i32>} : memref<2x256xf32, #tpu.memory_space<vmem>>, vector<2x256xf32>,
      } else {
      }
      %c0_20 = arith.constant 0 : index
      %c0_21 = arith.constant 0 : index
      %37 = vector.load %arg10[%c0_20, %c0_21] : memref<2x256xf32, #tpu.memory_space<vmem>>, vector<1x256xf32>
      %cst_22 = arith.constant dense<0.000000e+00> : vector<256xf32>
      %38 = vector.multi_reduction <add>, %30, %cst_22 [0] : vector<32x256xf32> to vector<256xf32>
      %39 = vector.shape_cast %38 : vector<256xf32> to vector<1x256xf32>
      %40 = arith.addf %37, %39 : vector<1x256xf32>
      %c0_23 = arith.constant 0 : index
      %c0_24 = arith.constant 0 : index
      %41 = vector.load %arg10[%c0_23, %c0_24] : memref<2x256xf32, #tpu.memory_space<vmem>>, vector<1x256xf32>
      tpu.vector_store %arg10[%c0_23, %c0_24], %40 {strides = array<i32>} : memref<2x256xf32, #tpu.memory_space<vmem>>, vector<1x256xf32>,
      %c1 = arith.constant 1 : index
      %c0_25 = arith.constant 0 : index
      %42 = vector.load %arg10[%c1, %c0_25] : memref<2x256xf32, #tpu.memory_space<vmem>>, vector<1x256xf32>
      %43 = arith.mulf %30, %30 : vector<32x256xf32>
      %cst_26 = arith.constant dense<0.000000e+00> : vector<256xf32>
      %44 = vector.multi_reduction <add>, %43, %cst_26 [0] : vector<32x256xf32> to vector<256xf32>
      %45 = vector.shape_cast %44 : vector<256xf32> to vector<1x256xf32>
      %46 = arith.addf %42, %45 : vector<1x256xf32>
      %c1_27 = arith.constant 1 : index
      %c0_28 = arith.constant 0 : index
      %47 = vector.load %arg10[%c1_27, %c0_28] : memref<2x256xf32, #tpu.memory_space<vmem>>, vector<1x256xf32>
      tpu.vector_store %arg10[%c1_27, %c0_28], %46 {strides = array<i32>} : memref<2x256xf32, #tpu.memory_space<vmem>>, vector<1x256xf32>,
    } else {
    }
    %c1_i32 = arith.constant 1 : i32
    %15 = arith.cmpi eq, %arg0, %c1_i32 : i32
    %16 = arith.extui %15 : i1 to i32
    %c0_i32_2 = arith.constant 0 : i32
    %17 = arith.cmpi ne, %16, %c0_i32_2 : i32
    scf.if %17 {
      %c0_i32_4 = arith.constant 0 : i32
      %21 = arith.cmpi eq, %arg1, %c0_i32_4 : i32
      %22 = arith.extui %21 : i1 to i32
      %c0_i32_5 = arith.constant 0 : i32
      %23 = arith.cmpi ne, %22, %c0_i32_5 : i32
      scf.if %23 {
        %c0_28 = arith.constant 0 : index
        %c0_29 = arith.constant 0 : index
        %64 = vector.load %arg10[%c0_28, %c0_29] : memref<2x256xf32, #tpu.memory_space<vmem>>, vector<1x256xf32>
        %cst_30 = arith.constant 1.562500e-02 : f32
        %65 = vector.broadcast %cst_30 : f32 to vector<1x256xf32>
        %66 = arith.mulf %64, %65 : vector<1x256xf32>
        %c1_31 = arith.constant 1 : index
        %c0_32 = arith.constant 0 : index
        %67 = vector.load %arg10[%c1_31, %c0_32] : memref<2x256xf32, #tpu.memory_space<vmem>>, vector<1x256xf32>
        %cst_33 = arith.constant 1.562500e-02 : f32
        %68 = vector.broadcast %cst_33 : f32 to vector<1x256xf32>
        %69 = arith.mulf %67, %68 : vector<1x256xf32>
        %70 = arith.mulf %66, %66 : vector<1x256xf32>
        %71 = arith.subf %69, %70 : vector<1x256xf32>
        %cst_34 = arith.constant 0.000000e+00 : f32
        %72 = vector.broadcast %cst_34 : f32 to vector<1x256xf32>
        %73 = arith.maximumf %71, %72 : vector<1x256xf32>
        %cst_35 = arith.constant 9.99999974E-6 : f32
        %74 = vector.broadcast %cst_35 : f32 to vector<1x256xf32>
        %75 = arith.addf %73, %74 : vector<1x256xf32>
        %76 = math.rsqrt %75 : vector<1x256xf32>
        %77 = arith.mulf %4, %76 : vector<1x256xf32>
        %c0_36 = arith.constant 0 : index
        %c0_37 = arith.constant 0 : index
        %78 = vector.load %arg12[%c0_36, %c0_37] : memref<2x256xf32, #tpu.memory_space<vmem>>, vector<1x256xf32>
        tpu.vector_store %arg12[%c0_36, %c0_37], %77 {strides = array<i32>} : memref<2x256xf32, #tpu.memory_space<vmem>>, vector<1x256xf32>,
        %79 = arith.mulf %66, %4 : vector<1x256xf32>
        %80 = arith.mulf %79, %76 : vector<1x256xf32>
        %81 = arith.subf %5, %80 : vector<1x256xf32>
        %c1_38 = arith.constant 1 : index
        %c0_39 = arith.constant 0 : index
        %82 = vector.load %arg12[%c1_38, %c0_39] : memref<2x256xf32, #tpu.memory_space<vmem>>, vector<1x256xf32>
        tpu.vector_store %arg12[%c1_38, %c0_39], %81 {strides = array<i32>} : memref<2x256xf32, #tpu.memory_space<vmem>>, vector<1x256xf32>,
        %cst_40 = arith.constant 0.000000e+00 : f32
        %83 = vector.broadcast %cst_40 : f32 to vector<2x256xf32>
        %c0_41 = arith.constant 0 : index
        %c0_42 = arith.constant 0 : index
        %84 = vector.load %arg11[%c0_41, %c0_42] : memref<2x256xf32, #tpu.memory_space<vmem>>, vector<2x256xf32>
        tpu.vector_store %arg11[%c0_41, %c0_42], %83 {strides = array<i32>} : memref<2x256xf32, #tpu.memory_space<vmem>>, vector<2x256xf32>,
      } else {
      }
      %24 = arith.index_cast %1 : i32 to index
      %c0_6 = arith.constant 0 : index
      %25 = vector.load %arg7[%24, %c0_6] : memref<64x256xf32, #tpu.memory_space<vmem>>, vector<32x256xf32>
      %c0_7 = arith.constant 0 : index
      %c0_8 = arith.constant 0 : index
      %26 = vector.load %arg12[%c0_7, %c0_8] : memref<2x256xf32, #tpu.memory_space<vmem>>, vector<1x256xf32>
      %27 = vector.broadcast %26 : vector<1x256xf32> to vector<32x256xf32>
      %28 = arith.mulf %25, %27 : vector<32x256xf32>
      %c1 = arith.constant 1 : index
      %c0_9 = arith.constant 0 : index
      %29 = vector.load %arg12[%c1, %c0_9] : memref<2x256xf32, #tpu.memory_space<vmem>>, vector<1x256xf32>
      %30 = vector.broadcast %29 : vector<1x256xf32> to vector<32x256xf32>
      %31 = arith.addf %28, %30 : vector<32x256xf32>
      %cst = arith.constant 0.000000e+00 : f32
      %32 = vector.broadcast %cst : f32 to vector<32x256xf32>
      %33 = arith.maximumf %31, %32 : vector<32x256xf32>
      %c128 = arith.constant 128 : index
      %c0_10 = arith.constant 0 : index
      %34 = vector.load %arg3[%c128, %c0_10] : memref<768x256xbf16, #tpu.memory_space<vmem>>, vector<256x256xbf16>
      %35 = arith.truncf %33 : vector<32x256xf32> to vector<32x256xbf16>
      %cst_11 = arith.constant dense<0.000000e+00> : vector<32x256xf32>
      %36 = tpu.matmul %35, %34, %cst_11 {dimension_numbers = #tpu.dot_dimension_numbers<[1], [0], [0], [1], [0, 0, 1, 1], [], []>} : vector<32x256xbf16>, vector<256x256xbf16>, vector<32x256xf32> -> vector<32x256xf32>
      %37 = vector.broadcast %6 : vector<1x256xf32> to vector<32x256xf32>
      %38 = arith.addf %36, %37 : vector<32x256xf32>
      %cst_12 = arith.constant 0.000000e+00 : f32
      %39 = vector.broadcast %cst_12 : f32 to vector<32x256xf32>
      %40 = arith.maximumf %38, %39 : vector<32x256xf32>
      %c512 = arith.constant 512 : index
      %c0_13 = arith.constant 0 : index
      %41 = vector.load %arg3[%c512, %c0_13] : memref<768x256xbf16, #tpu.memory_space<vmem>>, vector<256x128xbf16>
      %42 = arith.truncf %40 : vector<32x256xf32> to vector<32x256xbf16>
      %cst_14 = arith.constant dense<0.000000e+00> : vector<32x128xf32>
      %43 = tpu.matmul %42, %41, %cst_14 {dimension_numbers = #tpu.dot_dimension_numbers<[1], [0], [0], [1], [0, 0, 1, 1], [], []>} : vector<32x256xbf16>, vector<256x128xbf16>, vector<32x128xf32> -> vector<32x128xf32>
      %44 = vector.broadcast %7 : vector<1x128xf32> to vector<32x128xf32>
      %45 = arith.addf %43, %44 : vector<32x128xf32>
      %c384 = arith.constant 384 : index
      %c0_15 = arith.constant 0 : index
      %46 = vector.load %arg3[%c384, %c0_15] : memref<768x256xbf16, #tpu.memory_space<vmem>>, vector<128x256xbf16>
      %47 = arith.truncf %45 : vector<32x128xf32> to vector<32x128xbf16>
      %cst_16 = arith.constant dense<0.000000e+00> : vector<32x256xf32>
      %48 = tpu.matmul %47, %46, %cst_16 {dimension_numbers = #tpu.dot_dimension_numbers<[1], [0], [0], [1], [0, 0, 1, 1], [], []>} : vector<32x128xbf16>, vector<128x256xbf16>, vector<32x256xf32> -> vector<32x256xf32>
      %49 = vector.broadcast %8 : vector<1x256xf32> to vector<32x256xf32>
      %50 = arith.addf %48, %49 : vector<32x256xf32>
      %51 = arith.index_cast %1 : i32 to index
      %c0_17 = arith.constant 0 : index
      %52 = vector.load %arg8[%51, %c0_17] : memref<64x256xf32, #tpu.memory_space<vmem>>, vector<32x256xf32>
      tpu.vector_store %arg8[%51, %c0_17], %50 {strides = array<i32>} : memref<64x256xf32, #tpu.memory_space<vmem>>, vector<32x256xf32>,
      %c0_18 = arith.constant 0 : index
      %c0_19 = arith.constant 0 : index
      %53 = vector.load %arg11[%c0_18, %c0_19] : memref<2x256xf32, #tpu.memory_space<vmem>>, vector<1x256xf32>
      %cst_20 = arith.constant dense<0.000000e+00> : vector<256xf32>
      %54 = vector.multi_reduction <add>, %50, %cst_20 [0] : vector<32x256xf32> to vector<256xf32>
      %55 = vector.shape_cast %54 : vector<256xf32> to vector<1x256xf32>
      %56 = arith.addf %53, %55 : vector<1x256xf32>
      %c0_21 = arith.constant 0 : index
      %c0_22 = arith.constant 0 : index
      %57 = vector.load %arg11[%c0_21, %c0_22] : memref<2x256xf32, #tpu.memory_space<vmem>>, vector<1x256xf32>
      tpu.vector_store %arg11[%c0_21, %c0_22], %56 {strides = array<i32>} : memref<2x256xf32, #tpu.memory_space<vmem>>, vector<1x256xf32>,
      %c1_23 = arith.constant 1 : index
      %c0_24 = arith.constant 0 : index
      %58 = vector.load %arg11[%c1_23, %c0_24] : memref<2x256xf32, #tpu.memory_space<vmem>>, vector<1x256xf32>
      %59 = arith.mulf %50, %50 : vector<32x256xf32>
      %cst_25 = arith.constant dense<0.000000e+00> : vector<256xf32>
      %60 = vector.multi_reduction <add>, %59, %cst_25 [0] : vector<32x256xf32> to vector<256xf32>
      %61 = vector.shape_cast %60 : vector<256xf32> to vector<1x256xf32>
      %62 = arith.addf %58, %61 : vector<1x256xf32>
      %c1_26 = arith.constant 1 : index
      %c0_27 = arith.constant 0 : index
      %63 = vector.load %arg11[%c1_26, %c0_27] : memref<2x256xf32, #tpu.memory_space<vmem>>, vector<1x256xf32>
      tpu.vector_store %arg11[%c1_26, %c0_27], %62 {strides = array<i32>} : memref<2x256xf32, #tpu.memory_space<vmem>>, vector<1x256xf32>,
    } else {
    }
    %c2_i32 = arith.constant 2 : i32
    %18 = arith.cmpi eq, %arg0, %c2_i32 : i32
    %19 = arith.extui %18 : i1 to i32
    %c0_i32_3 = arith.constant 0 : i32
    %20 = arith.cmpi ne, %19, %c0_i32_3 : i32
    scf.if %20 {
      %c0_i32_4 = arith.constant 0 : i32
      %21 = arith.cmpi eq, %arg1, %c0_i32_4 : i32
      %22 = arith.extui %21 : i1 to i32
      %c0_i32_5 = arith.constant 0 : i32
      %23 = arith.cmpi ne, %22, %c0_i32_5 : i32
      scf.if %23 {
        %c0_13 = arith.constant 0 : index
        %c0_14 = arith.constant 0 : index
        %40 = vector.load %arg11[%c0_13, %c0_14] : memref<2x256xf32, #tpu.memory_space<vmem>>, vector<1x256xf32>
        %cst_15 = arith.constant 1.562500e-02 : f32
        %41 = vector.broadcast %cst_15 : f32 to vector<1x256xf32>
        %42 = arith.mulf %40, %41 : vector<1x256xf32>
        %c1_16 = arith.constant 1 : index
        %c0_17 = arith.constant 0 : index
        %43 = vector.load %arg11[%c1_16, %c0_17] : memref<2x256xf32, #tpu.memory_space<vmem>>, vector<1x256xf32>
        %cst_18 = arith.constant 1.562500e-02 : f32
        %44 = vector.broadcast %cst_18 : f32 to vector<1x256xf32>
        %45 = arith.mulf %43, %44 : vector<1x256xf32>
        %46 = arith.mulf %42, %42 : vector<1x256xf32>
        %47 = arith.subf %45, %46 : vector<1x256xf32>
        %cst_19 = arith.constant 0.000000e+00 : f32
        %48 = vector.broadcast %cst_19 : f32 to vector<1x256xf32>
        %49 = arith.maximumf %47, %48 : vector<1x256xf32>
        %cst_20 = arith.constant 9.99999974E-6 : f32
        %50 = vector.broadcast %cst_20 : f32 to vector<1x256xf32>
        %51 = arith.addf %49, %50 : vector<1x256xf32>
        %52 = math.rsqrt %51 : vector<1x256xf32>
        %53 = arith.mulf %9, %52 : vector<1x256xf32>
        %c0_21 = arith.constant 0 : index
        %c0_22 = arith.constant 0 : index
        %54 = vector.load %arg13[%c0_21, %c0_22] : memref<2x256xf32, #tpu.memory_space<vmem>>, vector<1x256xf32>
        tpu.vector_store %arg13[%c0_21, %c0_22], %53 {strides = array<i32>} : memref<2x256xf32, #tpu.memory_space<vmem>>, vector<1x256xf32>,
        %55 = arith.mulf %42, %9 : vector<1x256xf32>
        %56 = arith.mulf %55, %52 : vector<1x256xf32>
        %57 = arith.subf %10, %56 : vector<1x256xf32>
        %c1_23 = arith.constant 1 : index
        %c0_24 = arith.constant 0 : index
        %58 = vector.load %arg13[%c1_23, %c0_24] : memref<2x256xf32, #tpu.memory_space<vmem>>, vector<1x256xf32>
        tpu.vector_store %arg13[%c1_23, %c0_24], %57 {strides = array<i32>} : memref<2x256xf32, #tpu.memory_space<vmem>>, vector<1x256xf32>,
      } else {
      }
      %24 = arith.index_cast %1 : i32 to index
      %c0_6 = arith.constant 0 : index
      %25 = vector.load %arg8[%24, %c0_6] : memref<64x256xf32, #tpu.memory_space<vmem>>, vector<32x256xf32>
      %c0_7 = arith.constant 0 : index
      %c0_8 = arith.constant 0 : index
      %26 = vector.load %arg13[%c0_7, %c0_8] : memref<2x256xf32, #tpu.memory_space<vmem>>, vector<1x256xf32>
      %27 = vector.broadcast %26 : vector<1x256xf32> to vector<32x256xf32>
      %28 = arith.mulf %25, %27 : vector<32x256xf32>
      %c1 = arith.constant 1 : index
      %c0_9 = arith.constant 0 : index
      %29 = vector.load %arg13[%c1, %c0_9] : memref<2x256xf32, #tpu.memory_space<vmem>>, vector<1x256xf32>
      %30 = vector.broadcast %29 : vector<1x256xf32> to vector<32x256xf32>
      %31 = arith.addf %28, %30 : vector<32x256xf32>
      %cst = arith.constant 0.000000e+00 : f32
      %32 = vector.broadcast %cst : f32 to vector<32x256xf32>
      %33 = arith.maximumf %31, %32 : vector<32x256xf32>
      %c512 = arith.constant 512 : index
      %c128 = arith.constant 128 : index
      %34 = vector.load %arg3[%c512, %c128] : memref<768x256xbf16, #tpu.memory_space<vmem>>, vector<256x128xbf16>
      %35 = arith.truncf %33 : vector<32x256xf32> to vector<32x256xbf16>
      %cst_10 = arith.constant dense<0.000000e+00> : vector<32x128xf32>
      %36 = tpu.matmul %35, %34, %cst_10 {dimension_numbers = #tpu.dot_dimension_numbers<[1], [0], [0], [1], [0, 0, 1, 1], [], []>} : vector<32x256xbf16>, vector<256x128xbf16>, vector<32x128xf32> -> vector<32x128xf32>
      %37 = vector.broadcast %11 : vector<1x128xf32> to vector<32x128xf32>
      %38 = arith.addf %36, %37 : vector<32x128xf32>
      %c0_11 = arith.constant 0 : index
      %c0_12 = arith.constant 0 : index
      %39 = vector.load %arg6[%c0_11, %c0_12] : memref<32x128xf32, #tpu.memory_space<vmem>>, vector<32x128xf32>
      tpu.vector_store %arg6[%c0_11, %c0_12], %38 {strides = array<i32>} : memref<32x128xf32, #tpu.memory_space<vmem>>, vector<32x128xf32>,
    } else {
    }
    return
  }
  func.func @transform_0(%arg0: i32, %arg1: i32) -> (i32, i32) {
    %c2_i32 = arith.constant 2 : i32
    %0 = arith.muli %arg0, %c2_i32 : i32
    %1 = arith.subi %arg1, %0 : i32
    %c0_i32 = arith.constant 0 : i32
    %2 = arith.maxsi %1, %c0_i32 : i32
    %c0_i32_0 = arith.constant 0 : i32
    %c0_i32_1 = arith.constant 0 : i32
    return %2, %c0_i32_0 : i32, i32
  }
  func.func @transform_1(%arg0: i32, %arg1: i32) -> (i32, i32) {
    %c0_i32 = arith.constant 0 : i32
    %c0_i32_0 = arith.constant 0 : i32
    %c0_i32_1 = arith.constant 0 : i32
    return %c0_i32, %c0_i32_0 : i32, i32
  }
  func.func @transform_2(%arg0: i32, %arg1: i32) -> (i32, i32) {
    %c0_i32 = arith.constant 0 : i32
    %c0_i32_0 = arith.constant 0 : i32
    %c0_i32_1 = arith.constant 0 : i32
    return %c0_i32, %c0_i32_0 : i32, i32
  }
  func.func @transform_3(%arg0: i32, %arg1: i32) -> (i32, i32) {
    %c2_i32 = arith.constant 2 : i32
    %0 = arith.muli %arg0, %c2_i32 : i32
    %1 = arith.addi %arg1, %0 : i32
    %c1_i32 = arith.constant 1 : i32
    %2 = arith.minsi %1, %c1_i32 : i32
    %c0_i32 = arith.constant 0 : i32
    %c0_i32_0 = arith.constant 0 : i32
    return %2, %c0_i32 : i32, i32
  }
  func.func @transform_4(%arg0: i32, %arg1: i32) -> (i32, i32) {
    %c2_i32 = arith.constant 2 : i32
    %0 = arith.subi %c2_i32, %arg0 : i32
    %c2_i32_0 = arith.constant 2 : i32
    %1 = arith.muli %0, %c2_i32_0 : i32
    %2 = arith.subi %arg1, %1 : i32
    %c0_i32 = arith.constant 0 : i32
    %3 = arith.maxsi %2, %c0_i32 : i32
    %c0_i32_1 = arith.constant 0 : i32
    %c0_i32_2 = arith.constant 0 : i32
    return %3, %c0_i32_1 : i32, i32
  }
}

</mosaic_0001>

<bundles_post_ra>
// kernel: tpu_custom_call.1
= control target key start
LH: loop header
LB: loop body
LE: loop exit
PB: predicated region body
PF: predicated region fallthrough
CT: control target
= control target key end

     0   :  { %s3370_s0 = inlined_call_operand.hbm [shape: f32[64,60], index: 0, kind: input, shape index: {}]   ;;  %s3371_s1 = inlined_call_operand.hbm [shape: bf16[768,256], index: 1, kind: input, shape index: {}]   ;;  %s3372_s2 = inlined_call_operand.hbm [shape: f32[16,256], index: 2, kind: input, shape index: {}]   ;;  %s3373_s3 = inlined_call_operand.hbm [shape: f32[64,256], index: 3, kind: output, shape index: {0}]   ;;  %s3374_s4 = inlined_call_operand.hbm [shape: f32[64,128], index: 4, kind: output, shape index: {1}]  }
   0x1   :  { %3391 = sst [smem:[#allocation32_spill]] %s3371_s1 }
   0x2   :  { %3392 = sst [smem:[#allocation33_spill]] %s3372_s2 }
   0x3   :  { %3393 = sst [smem:[#allocation34_spill]] %s3373_s3 }
   0x4   :  { %3394 = sst [smem:[#allocation35_spill]] %s3374_s4 }
   0x5   :  { %10 = vsyncpa [#allocation10], 0 }
   0x6   :  { %12 = vsyncpa [#allocation10 + $0x1], 0 }
   0x7   :  { %13 = vsyncpa [#allocation13], 0 }
   0x8   :  { %14 = vsyncpa [#allocation11], 0 }
   0x9   :  { %16 = vsyncpa [#allocation11 + $0x1], 0 }
   0xa   :  { %17 = vsyncpa [#allocation17], 0 }
   0xb   :  { %19 = vsyncpa [#allocation17 + $0x1], 0  ;;  %s2896_s15 = smov 0   ;;  %s2898_s16 = smov 0  }
   0xc   :  { %s2900_s17 = smov 0   ;;  %s2902_s18 = smov 0  }
   0xd   :  { %s2904_s19 = smov 0   ;;  %s2906_s20 = smov 0  }
   0xe   :  { %s2908_s21 = smov 0   ;;  %s2910_s22 = smov 0  }
   0xf   :  { %s2912_s23 = smov 0   ;;  %s2914_s24 = smov 0  }
  0x10   :  { %s2916_s25 = smov 0   ;;  %s2918_s26 = smov 0  }
  0x11   :  { %s2920_s27 = smov 0   ;;  %s2922_s28 = smov 0  }
  0x12 LB: > { %3395 = sst [smem:[#allocation22_spill]] %s2795_s15  ;;  %s2049_s29 = sadd.s32 4294967295, %s2847_s28   ;;  %s2847_s28 = sphi %s2922_s28, %s25_s28   ;;  %s2843_s27 = sphi %s2920_s27, %s3436_s27   ;;  %s2839_s26 = sphi %s2918_s26, %s3446_s26   ;;  %s2835_s25 = sphi %s2916_s25, %s3435_s25   ;;  %s2831_s24 = sphi %s2914_s24, %s3434_s24   ;;  %s2827_s23 = sphi %s2912_s23, %s3445_s23   ;;  %s2823_s22 = sphi %s2910_s22, %s3444_s22   ;;  %s2819_s21 = sphi %s2908_s21, %s3443_s21   ;;  %s2815_s20 = sphi %s2906_s20, %s3442_s20   ;;  %s2811_s19 = sphi %s2904_s19, %s3441_s19   ;;  %s2807_s18 = sphi %s2902_s18, %s3440_s18   ;;  %s2803_s17 = sphi %s2900_s17, %s3439_s17   ;;  %s2799_s16 = sphi %s2898_s16, %s3438_s16   ;;  %s2795_s15 = sphi %s2896_s15, %s3437_s15  }
  0x13   : > { %3396 = sst [smem:[#allocation23_spill]] %s2807_s18  ;;  %s2050_s30 = sadd.s32 4294967294, %s2847_s28  }
  0x14   : > { %3397 = sst [smem:[#allocation24_spill]] %s2839_s26  ;;  %p65_p0 = scmp.ne.s32.totalorder %s2823_s22, %s2819_s21 }
  0x15   : > { %3398 = sst [smem:[#allocation25_spill]] %s2843_s27  ;;  %p2967_p1 = scmp.eq.s32.totalorder %s2049_s29, 0 }
  0x16   : > { %p138_p2 = scmp.ne.s32.totalorder %s2815_s20, %s2811_s19  ;;  %p139_p4 = scmp.eq.s32.totalorder %s2049_s29, 5 }
  0x17   : > { %p2975_p3 = por %p2967_p1, %p65_p0  ;;  %p144_p5 = scmp.ne.s32.totalorder %s2811_s19, %s2807_s18 }
  0x18   : > { %p145_p6 = scmp.eq.s32.totalorder %s2050_s30, 5  ;;  %p2982_p7 = por %p139_p4, %p138_p2 }
  0x19   : > { %p174_p9 = scmp.ne.s32.totalorder %s2803_s17, %s2799_s16  ;;  %p180_p10 = scmp.ne.s32.totalorder %s2799_s16, %s2795_s15 }
  0x1a   : > { %s3401_s8 = scalar_select %p2982_p7, 1, 0 }
  0x1b   : > { %p2986_p8 = por %p145_p6, %p144_p5  ;;  %p2057_p11 = scmp.ge.s32.totalorder %s2847_s28, 1 }
  0x1c   : > { %3402 = sst [smem:[#allocation26_spill]] %s3401_s8  ;;  %p2995_p12 = por %p174_p9, %p139_p4 }
  0x1d   : > { %s3403_s9 = scalar_select %p2986_p8, 1, 0 }
  0x1e   : > { %s3405_s10 = scalar_select %p2995_p12, 1, 0 }
  0x1f   : > { %3404 = sst [smem:[#allocation27_spill]] %s3403_s9  ;;  %p188_p13 = scmp.lt.s32.totalorder %s2847_s28, 7 }
  0x20   : > { %3406 = sst [smem:[#allocation28_spill]] %s3405_s10  ;;  %p3000_p0 = por %p180_p10, %p145_p6 }
  0x21   : > { %p3004_p2 = pnand %p2057_p11, %p188_p13  ;;  %s2849_s13 = smov [#allocation12]  }
  0x22   : > { %s3407_s11 = scalar_select %p3000_p0, 1, 0 }
  0x23   : > { %s200_s14 = sshll.u32 %s2849_s13, 4  ;;  %p2302_p5 = pneg %p3004_p2  ;;  %s201_s14 = int_to_ptr.vmem [resolvable:$true] %s200_s14 }
  0x24   : > { %3408 = sst [smem:[#allocation29_spill]] %s3407_s11  ;;  %s2850_s29 = smov [#allocation14]  }
  0x25   : > { %p3012_p4 = pnand %p2302_p5, %p2967_p1  ;;  %s213_s30 = sshll.u32 %s2850_s29, 4  ;;  %s214_s30 = int_to_ptr.vmem [resolvable:$true] %s213_s30 }
  0x26   : > { %s2600_s7 = scalar_lea.vmem %s201_s14, 12288  ;;  %p2608_p13 = scmp.lt.s32.totalorder %s201_s14, %s201_s14 }
  0x27   : > { %p2591_p6 = pneg %p3012_p4  ;;  %p2601_p9 = scmp.ne.s32.totalorder %s201_s14, %s2600_s7 }
  0x28   : > { %p2609_p0 = scmp.lt.s32.totalorder %s2600_s7, %s2600_s7 }
  0x29   : > { %p2603_p10 = pnand %p2601_p9, %p2591_p6 }
  0x2a   : > { %p2610_p8 = por %p2609_p0, %p2608_p13 }
  0x2b   : > { %p2604_p11 = pneg %p2603_p10 }
  0x2d   : > { %p2611_p5 = pnand %p2610_p8, %p2604_p11 }
  0x2f   : > { %2614 = shalt.err (!%p2611_p5)
}
  0x30   : > { %s3378_s13 = smov 128   ;;  %s3379_s11 = smov 8  }
  0x31   : > { %s3411_s1 = sld [smem:[#allocation32_spill]]  ;;  %s2626_s9 = scalar_lea.vmem %s214_s30, 512 }
  0x32   : > { %p2627_p9 = scmp.ne.s32.totalorder %s214_s30, %s2626_s9  ;;  %p2634_p8 = scmp.lt.s32.totalorder %s214_s30, %s214_s30 }
  0x33   : > { %p2635_p11 = scmp.lt.s32.totalorder %s2626_s9, %s2626_s9 }
  0x34   : > { %p2629_p10 = pnand %p2627_p9, %p2591_p6 }
  0x35   : > { %p2636_p13 = por %p2635_p11, %p2634_p8 }
  0x36   : > { %p2630_p0 = pneg %p2629_p10 }
  0x37   : > { %2305 = dma.hbm_to_vmem [thread:$0]  (!%p3012_p4), %s3411_s1, 12288, %s201_s14, [#allocation13], %s3378_s13, %s3378_s13, %s3379_s11  }
  0x38   : > { %p2637_p5 = pnand %p2636_p13, %p2630_p0 }
  0x3a   : > { %2640 = shalt.err (!%p2637_p5)
}
  0x3b   : > { %s2853_s7 = smov 256   ;;  %s2854_s15 = smov 16  }
  0x3c   : > { %s3412_s2 = sld [smem:[#allocation33_spill]]  ;;  %s34_s13 = sadd.s32 1, %s2839_s26 }
  0x3d   : > { %p35_p6 = scmp.ge.s32.totalorder %s34_s13, 2  ;;  %s37_s11 = sadd.s32 1, %s2843_s27 }
  0x3e   : > { %s2051_s1 = sshll.u32 %s2843_s27, 1  ;;  %s52_s4 = sadd.s32 1, %s2827_s23 }
  0x3f   : > { %s3448_s13 = smov (%p35_p6, %s34_s13), 0  ;;  %s3450_s11 = smov (!%p35_p6, %s37_s11), %s2843_s27 }
  0x40   : > { %s42_s18 = ssub.s32 %s2839_s26, %s2051_s1  ;;  %p39_p9 = scmp.ge.s32.totalorder %s3450_s11, 3 }
  0x41   : > { %p43_p10 = scmp.gt.s32.totalorder %s42_s18, 0  ;;  %p59_p0 = scmp.ne.s32.totalorder %s2827_s23, %s2823_s22 }
  0x42   : > { %2308 = dma.hbm_to_vmem [thread:$0]  (!%p3012_p4), %s3412_s2, 512, %s214_s30, [#allocation13], %s2853_s7, %s2853_s7, %s2854_s15  }
  0x43   : > { %s118_s21 = sadd.s32 %s2839_s26, %s2051_s1  ;;  %s3452_s11 = smov (%p39_p9, %s3450_s11), 0 }
  0x44   : > { %3413 = sst [smem:[#allocation30_spill]] %s3452_s11  ;;  %s3454_s18 = smov (!%p43_p10, %s42_s18), 0 }
  0x45   : > { %s2052_s30 = sshll.u32 %s3452_s11, 1  ;;  %p60_p4 = scmp.eq.s32.totalorder %s2847_s28, 0 }
  0x46   : > { %s46_s7 = ssub.s32 %s3448_s13, %s2052_s30  ;;  %p119_p8 = scmp.lt.s32.totalorder %s118_s21, 1 }
  0x47   : > { %p47_p11 = scmp.gt.s32.totalorder %s46_s7, 0  ;;  %s122_s15 = sadd.s32 %s2052_s30, %s3448_s13 }
  0x48   : > { %s3456_s21 = smov (!%p119_p8, %s118_s21), 1  ;;  %p123_p13 = scmp.lt.s32.totalorder %s122_s15, 1 }
  0x49   : > { %s3458_s7 = smov (!%p47_p11, %s46_s7), 0  ;;  %s151_s1 = ssub.s32 2, %s2843_s27 }
  0x4a   : > { %s49_s14 = ssub.s32 %s3454_s18, %s3458_s7  ;;  %s2055_s29 = sshll.u32 %s151_s1, 1 }
  0x4b   : > { %p50_p5 = scmp.eq.s32.totalorder %s49_s14, 0  ;;  %s153_s9 = ssub.s32 %s2839_s26, %s2055_s29 }
  0x4c   : > { %s3460_s15 = smov (!%p123_p13, %s122_s15), 1  ;;  %p154_p6 = scmp.gt.s32.totalorder %s153_s9, 0 }
  0x4d   : > { %s3061_s2 = scalar_select %p50_p5, %s2827_s23, %s52_s4  }
  0x4e   : > { %s125_s30 = ssub.s32 %s3456_s21, %s3460_s15  ;;  %s156_s10 = ssub.s32 2, %s3452_s11 }
  0x4f   : > { %3414 = sst [smem:[#allocation31_spill]] %s3061_s2  ;;  %p126_p9 = scmp.eq.s32.totalorder %s125_s30, 0 }
  0x50   : > { %s3462_s9 = smov (!%p154_p6, %s153_s9), 0  ;;  %s3415_s3 = sadd.s32 1, %s2815_s20 }
  0x51   : > { %s3067_s8 = scalar_select %p126_p9, %s2815_s20, %s3415_s3  }
  0x52   : > { %p3074_p10 = por %p60_p4, %p59_p0  ;;  %s2056_s1 = sshll.u32 %s156_s10, 1 }
  0x53   : > { %s158_s4 = ssub.s32 %s3448_s13, %s2056_s1  ;;  %s227_s14 = sand.u32 1, %s2827_s23  }
  0x54   : > { %p159_p8 = scmp.gt.s32.totalorder %s158_s4, 0  ;;  %p2322_p11 = scmp.lt.s32.totalorder %s2847_s28, 6 }
  0x55   : > { %s2061_s21 = sshll.u32 %s227_s14, 5  ;;  %s2192_s15 = sshll.u32 %s3454_s18, 9 }
  0x56   : > { %s3464_s4 = smov (!%p159_p8, %s158_s4), 0  ;;  %s231_s3 = scalar_lea.vmem [#allocation9], %s2061_s21 }
  0x57   : > { %s161_s29 = ssub.s32 %s3462_s9, %s3464_s4  ;;  %s242_s30 = sshll.u32 %s231_s3, 4  ;;  %s243_s30 = int_to_ptr.vmem [resolvable:$true] %s242_s30 }
  0x58   : > { %p162_p13 = scmp.eq.s32.totalorder %s161_s29, 0  ;;  %s241_s26 = scalar_lea.hbm %s3370_s0, %s2192_s15 }
  0x59   : > { %p3087_p0 = pnand %p2322_p11, %p3074_p10  ;;  %s3418_s10 = sadd.s32 1, %s2803_s17 }
  0x5a   : > { %s3094_s1 = scalar_select %p162_p13, %s2803_s17, %s3418_s10  }
  0x5b   : > { %s228_s18 = scalar_lea.sflag [#allocation10], %s227_s14  ;;  %p2643_p4 = pneg %p3087_p0 }
  0x5c   : > { %s2654_s9 = scalar_lea.vmem %s243_s30, 512  ;;  %s2855_s4 = smov [#allocation9]  }
  0x5d   : > { %p2655_p5 = scmp.ne.s32.totalorder %s243_s30, %s2654_s9  ;;  %s2659_s27 = sshll.u32 %s2855_s4, 4  ;;  %s2660_s27 = int_to_ptr.vmem [resolvable:$false] %s2659_s27 }
  0x5e   : > { %s2661_s11 = scalar_lea.vmem %s2660_s27, 1024  ;;  %p2662_p8 = scmp.lt.s32.totalorder %s243_s30, %s2660_s27 }
  0x5f   : > { %p2657_p6 = pnand %p2655_p5, %p2643_p4  ;;  %p2663_p10 = scmp.lt.s32.totalorder %s2661_s11, %s2654_s9 }
  0x61   : > { %p2658_p9 = pneg %p2657_p6  ;;  %p2664_p11 = por %p2663_p10, %p2662_p8 }
  0x63   : > { %p2665_p12 = pnand %p2664_p11, %p2658_p9 }
  0x65   : > { %2668 = shalt.err (!%p2665_p12)
}
  0x66   : > { %s3419_s7 = smov 8   ;;  %s3420_s21 = smov 128  }
  0x67   : > { %2312 = dma.hbm_to_vmem [thread:$0]  (!%p3087_p0), %s241_s26, 512, %s243_s30, %s228_s18, %s3420_s21, %s3420_s21, %s3419_s7  }
  0x68   : > { %254 = sbr.rel (%p3004_p2) target bundleno = 1501 (0x5dd), region = 32  ;;  %s256_s14 = sand.u32 (!%p3004_p2), 1, %s2823_s22  }
  0x69   : > { %s2066_s15 = sshll.u32 (!%p3004_p2), %s256_s14, 5  ;;  %s257_s29 = scalar_lea.sflag (!%p3004_p2), [#allocation10], %s256_s14 }
  0x6a   : > { %s3106_s3 = scalar_lea.vmem (!%p3004_p2), [#allocation9], %s2066_s15 }
  0x6d   : > { %2778 = dma.done.wait (%p2975_p3), %s257_s29, 512  }
  0x6e   : > { %2780 = vsyncadd (%p2975_p3), %s257_s29, 4294966784 }
  0x6f   : > { %2782 = dma.done.wait (%p2967_p1), [#allocation13], 12800  }
  0x70   : > { %2784 = vsyncadd (%p2967_p1), [#allocation13], 4294954496  ;;  %s288_s2 = sand.u32 1, %s2811_s19   ;;  %s295_s26 = sand.u32 1, %s2799_s16   ;;  %v3125_v0 = vld [vmem:[#allocation14] sm:$0xff]  ;;  %v3127_v1 = vld [vmem:[#allocation14 + $0x8] sm:$0xff] }
  0x71   : > { %s2069_s12 = sshll.u32 %s288_s2, 6  ;;  %s2070_s30 = sshll.u32 %s295_s26, 5  ;;  %v3129_v2 = vld [vmem:[#allocation14 + $0x10] sm:$0xff] }
  0x72   : > { %s3123_s10 = sshll.u32 %s2831_s24, 5  ;;  %s3131_s5 = scalar_lea.vmem [#allocation15], %s2069_s12 }
  0x73   : > { %s3133_s6 = scalar_lea.vmem [#allocation16], %s2070_s30  ;;  %p2072_p1 = scmp.ne.s32.totalorder %s2835_s25, 0 }
  0x74   : > { %s507_s18 = sshra.s32 (!%p2072_p1), %s3123_s10, 3  ;;  %p2091_p3 = scmp.ne.s32.totalorder (!%p2072_p1), %s2831_s24, 0 }
  0x75   : > { %322 = sbr.rel (%p2072_p1) target bundleno = 391 (0x187), region = 48  ;;  %s2193_s9 = sshll.u32 (!%p2072_p1), %s507_s18, 4 }
  0x76   : > { %s511_s4 = scalar_lea.vmem (!%p2072_p1), [#allocation2], %s2193_s9 }
  0x7a   : > { %v2457_v3 = vld [vmem:[#allocation12 + $0x74] ss:$8 sps:$4 sm:$0xff]   ;;  %v2459_v4 = vld [vmem:[#allocation12 + $0x70] ss:$8 sps:$4 sm:$0xff]   ;;  %v2856_v5 = vmov 0   ;;  %v2857_v6 = vmov 0.0   ;;  %v358_v31 = vlaneseq }
  0x7b   : > { %478 = vmatprep.mubr.bf16.mxu0 %v2856_v5  ;;  %488 = vmatprep.mubr.bf16.mxu1 %v2856_v5  ;;  %323 = vst [vmem:[#allocation4] sm:$0xff] %v2857_v6  ;;  %324 = vst [vmem:[#allocation4 + $0x8] sm:$0xff] %v2857_v6  ;;  %v2460_v7 = vld [vmem:[#allocation12 + $0x64] ss:$8 sps:$4 sm:$0xff]   ;;  %v2462_v8 = vld [vmem:[#allocation12 + $0x60] ss:$8 sps:$4 sm:$0xff]  }
  0x7c   : > { %325 = vst [vmem:[#allocation4 + $0x10] sm:$0xff] %v2857_v6  ;;  %326 = vst [vmem:[#allocation4 + $0x18] sm:$0xff] %v2857_v6  ;;  %446 = vmatprep.subr.bf16.mxu0 %v2457_v3  ;;  %2256 = vmatprep.subr.bf16.mxu1 %v2457_v3  ;;  %v2463_v9 = vld [vmem:[#allocation12 + $0x54] ss:$8 sps:$4 sm:$0xff]   ;;  %v2465_v10 = vld [vmem:[#allocation12 + $0x50] ss:$8 sps:$4 sm:$0xff]  }
  0x7d   : > { %447 = vmatpush1.bf16.msra.mxu0 %v2459_v4  ;;  %2264 = vmatpush1.bf16.msra.mxu1 %v2459_v4  ;;  %v2466_v11 = vld [vmem:[#allocation12 + $0x44] ss:$8 sps:$4 sm:$0xff]   ;;  %vm331_vm0 = vcmask 490496   ;;  %v2468_v12 = vld [vmem:[#allocation12 + $0x40] ss:$8 sps:$4 sm:$0xff]   ;;  %v329_v15 = vld [vmem:[%s3106_s3 + $0x10] sm:$0xff] }
  0x7e   : > { %448 = vmatprep.subr.bf16.mxu0 %v2460_v7  ;;  %2257 = vmatprep.subr.bf16.mxu1 %v2460_v7  ;;  %v327_v13 = vld [vmem:[%s3106_s3] sm:$0xff]  ;;  %v328_v14 = vld [vmem:[%s3106_s3 + $0x8] sm:$0xff]  ;;  %v330_v16 = vld [vmem:[%s3106_s3 + $0x18] sm:$0xff]  ;;  %334 = vst.msk [vmem:[#allocation4 + $0x10] sm:$0xff] %vm331_vm0, %v329_v15  ;;  %v3141_v32 = vshrl.u32 %v358_v31, 7 }
  0x7f   : > { %332 = vst.msk [vmem:[#allocation4] sm:$0xff] %vm331_vm0, %v327_v13  ;;  %v2469_v17 = vld [vmem:[#allocation12 + $0x34] ss:$8 sps:$4 sm:$0xff]   ;;  %333 = vst.msk [vmem:[#allocation4 + $0x8] sm:$0xff] %vm331_vm0, %v328_v14  ;;  %v2471_v18 = vld [vmem:[#allocation12 + $0x30] ss:$8 sps:$4 sm:$0xff]  }
  0x80   : > { %335 = vst.msk [vmem:[#allocation4 + $0x18] sm:$0xff] %vm331_vm0, %v330_v16  ;;  %v2472_v19 = vld [vmem:[#allocation12 + $0x24] ss:$8 sps:$4 sm:$0xff]   ;;  %v2474_v20 = vld [vmem:[#allocation12 + $0x20] ss:$8 sps:$4 sm:$0xff]   ;;  %v360_v33 = vsub.s32 0, %v3141_v32 }
  0x81   : > { %449 = vmatpush1.bf16.msra.mxu0 %v2462_v8  ;;  %2265 = vmatpush1.bf16.msra.mxu1 %v2462_v8  ;;  %v2475_v21 = vld [vmem:[#allocation12 + $0x14] ss:$8 sps:$4 sm:$0xff]   ;;  %v2477_v22 = vld [vmem:[#allocation12 + $0x10] ss:$8 sps:$4 sm:$0xff]   ;;  %v2478_v23 = vld [vmem:[#allocation12 + $0x4] ss:$8 sps:$4 sm:$0xff]  }
  0x82   : > { %450 = vmatprep.subr.bf16.mxu0 %v2463_v9  ;;  %2258 = vmatprep.subr.bf16.mxu1 %v2463_v9  ;;  %v2480_v24 = vld [vmem:[#allocation12] ss:$8 sps:$4 sm:$0xff]   ;;  %v361_v34 = vrot.slane %v3125_v0, %v360_v33  ;;  %v365_v35 = vrot.slane %v3127_v1, %v360_v33 }
  0x85   : > { %451 = vmatpush1.bf16.msra.mxu0 %v2465_v10  ;;  %2266 = vmatpush1.bf16.msra.mxu1 %v2465_v10  ;;  %v338_v27 = vld [vmem:[#allocation4 + $0x10] sm:$0xff] }
  0x86   : > { %452 = vmatprep.subr.bf16.mxu0 %v2466_v11  ;;  %2259 = vmatprep.subr.bf16.mxu1 %v2466_v11  ;;  %v336_v25 = vld [vmem:[#allocation4] sm:$0xff]  ;;  %v337_v26 = vld [vmem:[#allocation4 + $0x8] sm:$0xff] }
  0x87   : > { %v339_v28 = vld [vmem:[#allocation4 + $0x18] sm:$0xff]  ;;  %v340_v29 = vpack.c.bf16 %v337_v26, %v336_v25 }
  0x88   : > { %v341_v30 = vpack.c.bf16 %v339_v28, %v338_v27 }
  0x89   : > { %453 = vmatpush1.bf16.msra.mxu0 %v2468_v12  ;;  %2267 = vmatpush1.bf16.msra.mxu1 %v2468_v12 }
  0x8a   : > { %454 = vmatprep.subr.bf16.mxu0 %v2469_v17  ;;  %2260 = vmatprep.subr.bf16.mxu1 %v2469_v17 }
  0x8d   : > { %455 = vmatpush1.bf16.msra.mxu0 %v2471_v18  ;;  %2268 = vmatpush1.bf16.msra.mxu1 %v2471_v18 }
  0x8e   : > { %456 = vmatprep.subr.bf16.mxu0 %v2472_v19  ;;  %2261 = vmatprep.subr.bf16.mxu1 %v2472_v19 }
  0x91   : > { %457 = vmatpush1.bf16.msra.mxu0 %v2474_v20  ;;  %2269 = vmatpush1.bf16.msra.mxu1 %v2474_v20 }
  0x92   : > { %458 = vmatprep.subr.bf16.mxu0 %v2475_v21  ;;  %2262 = vmatprep.subr.bf16.mxu1 %v2475_v21 }
  0x95   : > { %459 = vmatpush1.bf16.msra.mxu0 %v2477_v22  ;;  %2270 = vmatpush1.bf16.msra.mxu1 %v2477_v22 }
  0x96   : > { %460 = vmatprep.subr.bf16.mxu0 %v2478_v23  ;;  %2263 = vmatprep.subr.bf16.mxu1 %v2478_v23 }
  0x99   : > { %461 = vmatpush1.bf16.msra.mxu0 %v2480_v24  ;;  %2271 = vmatpush1.bf16.msra.mxu1 %v2480_v24 }
  0x9c   : > { %479 = vmatmul.mubr.bf16.vlgmr.msra.gmra.mxu0 %v340_v29  ;;  %489 = vmatmul.mubr.bf16.vlgmr.msra.gmra.mxu1 %v341_v30 }
 0x15c   : > { %v480_v36 = vpop.f32.mrf.mxu0  ;;  %v490_v37 = vpop.f32.mrf.mxu1 }
 0x15d   : > { %v481_v38 = vadd.f32 %v480_v36, %v361_v34  ;;  %v491_v39 = vadd.f32 %v490_v37, %v361_v34 }
 0x15e   : > { %v482_v40 = vpop.f32.mrf.mxu0  ;;  %v492_v41 = vpop.f32.mrf.mxu1 }
 0x15f   : > { %499 = vst [vmem:[%s3131_s5] sm:$0xff] %v481_v38  ;;  %512 = vst [vmem:[%s511_s4] sm:$0xff] %v481_v38  ;;  %v483_v42 = vadd.f32 %v482_v40, %v365_v35  ;;  %v493_v43 = vadd.f32 %v492_v41, %v365_v35 }
 0x160   : > { %503 = vst [vmem:[%s3131_s5 + $0x20] sm:$0xff] %v491_v39  ;;  %516 = vst [vmem:[%s511_s4 + $0x20] sm:$0xff] %v491_v39  ;;  %v484_v44 = vpop.f32.mrf.mxu0  ;;  %v494_v45 = vpop.f32.mrf.mxu1 }
 0x161   : > { %500 = vst [vmem:[%s3131_s5 + $0x8] sm:$0xff] %v483_v42  ;;  %513 = vst [vmem:[%s511_s4 + $0x8] sm:$0xff] %v483_v42  ;;  %v485_v46 = vadd.f32 %v484_v44, %v361_v34  ;;  %v495_v47 = vadd.f32 %v494_v45, %v361_v34 }
 0x162   : > { %504 = vst [vmem:[%s3131_s5 + $0x28] sm:$0xff] %v493_v43  ;;  %517 = vst [vmem:[%s511_s4 + $0x28] sm:$0xff] %v493_v43  ;;  %v486_v48 = vpop.f32.mrf.mxu0  ;;  %v496_v49 = vpop.f32.mrf.mxu1  ;;  %523 = sbr.rel (%p2091_p3) target bundleno = 361 (0x169), region = 52 }
 0x163   : > { %501 = vst [vmem:[%s3131_s5 + $0x10] sm:$0xff] %v485_v46  ;;  %514 = vst [vmem:[%s511_s4 + $0x10] sm:$0xff] %v485_v46  ;;  %v487_v50 = vadd.f32 %v486_v48, %v365_v35  ;;  %v497_v51 = vadd.f32 %v496_v49, %v365_v35 }
 0x164   : > { %505 = vst [vmem:[%s3131_s5 + $0x30] sm:$0xff] %v495_v47  ;;  %518 = vst [vmem:[%s511_s4 + $0x30] sm:$0xff] %v495_v47 }
 0x165   : > { %502 = vst [vmem:[%s3131_s5 + $0x18] sm:$0xff] %v487_v50  ;;  %515 = vst [vmem:[%s511_s4 + $0x18] sm:$0xff] %v487_v50 }
 0x166   : > { %506 = vst [vmem:[%s3131_s5 + $0x38] sm:$0xff] %v497_v51  ;;  %519 = vst [vmem:[%s511_s4 + $0x38] sm:$0xff] %v497_v51 }
 0x167   : > { %v2858_v52 = vmov 0.0  }
 0x168   : > { %524 = vst [vmem:[#allocation5] sm:$0xf] %v2858_v52 }
 0x169 PF: > { %v526_v53 = vadd.f32 %v485_v46, %v481_v38  ;;  %v535_v54 = vadd.f32 %v487_v50, %v483_v42  ;;  %v570_v55 = vmul.f32 %v481_v38, %v481_v38  ;;  %v571_v56 = vmul.f32 %v483_v42, %v483_v42 }
 0x16a   : > { %v572_v57 = vmul.f32 %v485_v46, %v485_v46  ;;  %v573_v60 = vmul.f32 %v487_v50, %v487_v50  ;;  %v574_v61 = vmul.f32 %v491_v39, %v491_v39  ;;  %v575_v62 = vmul.f32 %v493_v43, %v493_v43 }
 0x16b   : > { %v527_v58 = vadd.f32 %v526_v53, %v491_v39  ;;  %v536_v59 = vadd.f32 %v535_v54, %v493_v43  ;;  %v576_v63 = vmul.f32 %v495_v47, %v495_v47  ;;  %v577_v3 = vmul.f32 %v497_v51, %v497_v51 }
 0x16c   : > { %v578_v6 = vadd.f32 %v572_v57, %v570_v55  ;;  %v587_v7 = vadd.f32 %v573_v60, %v571_v56  ;;  %v2859_v12 = vmov 1966171168   ;;  %vm565_vm1 = vcmp.lt.s32.totalorder %v358_v31, 256 }
 0x16d   : > { %v528_v4 = vadd.f32 %v527_v58, %v495_v47  ;;  %v537_v5 = vadd.f32 %v536_v59, %v497_v51  ;;  %v548_v13 = vunpack.c.l.s4 %v2859_v12 }
 0x16e   : > { %v579_v10 = vadd.f32 %v578_v6, %v574_v61  ;;  %v588_v11 = vadd.f32 %v587_v7, %v575_v62 }
 0x16f   : > { %v529_v8 = vrot.slane %v528_v4, 4  ;;  %v538_v9 = vrot.slane %v537_v5, 4  ;;  %v549_v22 = vunpack.c.0.s8 %v548_v13  ;;  %v525_v44 = vld [vmem:[#allocation5] ss:$2 sm:$0x3] }
 0x170   : > { %v580_v16 = vadd.f32 %v579_v10, %v576_v63  ;;  %v589_v17 = vadd.f32 %v588_v11, %v577_v3  ;;  %v569_v49 = vld [vmem:[#allocation5 + $0x1] ss:$2 sm:$0x3] }
 0x171   : > { %v530_v14 = vadd.f32 %v529_v8, %v528_v4  ;;  %v539_v15 = vadd.f32 %v538_v9, %v537_v5  ;;  %v552_v33 = vsub.s32 %v549_v22, %v3141_v32 }
 0x172   : > { %v581_v20 = vrot.slane %v580_v16, 4  ;;  %v590_v21 = vrot.slane %v589_v17, 4 }
 0x173   : > { %v531_v18 = vrot.slane %v530_v14, 2  ;;  %v540_v19 = vrot.slane %v539_v15, 2 }
 0x174   : > { %v582_v25 = vadd.f32 %v581_v20, %v580_v16  ;;  %v591_v26 = vadd.f32 %v590_v21, %v589_v17 }
 0x175   : > { %v532_v23 = vadd.f32 %v531_v18, %v530_v14  ;;  %v541_v24 = vadd.f32 %v540_v19, %v539_v15 }
 0x176   : > { %v583_v29 = vrot.slane %v582_v25, 2  ;;  %v592_v30 = vrot.slane %v591_v26, 2 }
 0x177   : > { %v533_v27 = vrot.slane %v532_v23, 1  ;;  %v542_v28 = vrot.slane %v541_v24, 1 }
 0x178   : > { %v584_v36 = vadd.f32 %v583_v29, %v582_v25  ;;  %v593_v37 = vadd.f32 %v592_v30, %v591_v26 }
 0x179   : > { %v534_v34 = vadd.f32 %v533_v27, %v532_v23  ;;  %v543_v35 = vadd.f32 %v542_v28, %v541_v24 }
 0x17a   : > { %v585_v39 = vrot.slane %v584_v36, 1  ;;  %v594_v40 = vrot.slane %v593_v37, 1 }
 0x17b   : > { %v546_v38 = vcombine.low %v534_v34, %v543_v35 }
 0x17c   : > { %v586_v42 = vadd.f32 %v585_v39, %v584_v36  ;;  %v595_v43 = vadd.f32 %v594_v40, %v593_v37 }
 0x17d   : > { %v553_v41 = vrot.slane %v546_v38, %v552_v33 }
 0x17e   : > { %v598_v46 = vcombine.low %v586_v42, %v595_v43 }
 0x17f   : > { %v560_v45 = vrot.slane %v553_v41, %v552_v33 }
 0x180   : > { %v605_v48 = vrot.slane %v598_v46, %v552_v33 }
 0x181   : > { %v562_v47 = vadd.f32 %v560_v45, %v525_v44 }
 0x182   : > { %v612_v32 = vrot.slane %v605_v48, %v552_v33 }
 0x183   : > { %567 = vst.msk [vmem:[#allocation5] ss:$2 sm:$0x3] %vm565_vm1, %v562_v47 }
 0x184   : > { %v614_v50 = vadd.f32 %v612_v32, %v569_v49 }
 0x186   : > { %615 = vst.msk [vmem:[#allocation5 + $0x1] ss:$2 sm:$0x3] %vm565_vm1, %v614_v50 }
 0x187 PF: > { %p2092_p12 = scmp.ne.s32.totalorder %s2835_s25, 1 }
 0x188   : > { %p2093_p2 = scmp.ne.s32.totalorder (!%p2092_p12), %s2831_s24, 0 }
 0x189   : > { %619 = sbr.rel (%p2092_p12) target bundleno = 1153 (0x481), region = 56 }
 0x18e   : > { %623 = sbr.rel (%p2093_p2) target bundleno = 443 (0x1bb), region = 60 }
 0x193   : > { %v624_v51 = vld [vmem:[#allocation5] ss:$2 sm:$0x3]  ;;  %v627_v52 = vld [vmem:[#allocation5 + $0x1] ss:$2 sm:$0x3]  ;;  %v635_v53 = vlaneseq  ;;  %v673_v62 = vcombine.low %v3125_v0, %v3127_v1 }
 0x194   : > { %v625_v54 = vmul.f32 0.015625, %v624_v51  ;;  %v628_v55 = vmul.f32 0.015625, %v627_v52  ;;  %v2860_v56 = vmov 1966171168   ;;  %v2861_v58 = vmov 0.0  }
 0x195   : > { %v636_v31 = vshrl.u32 %v635_v53, 7  ;;  %v651_v57 = vunpack.c.l.s4 %v2860_v56  ;;  %726 = vst [vmem:[#allocation6] sm:$0xf] %v2861_v58  ;;  %vm668_vm2 = vcmp.lt.s32.totalorder %v635_v53, 256 }
 0x196   : > { %v629_v59 = vmul.f32 %v625_v54, %v625_v54 }
 0x197   : > { %v652_v60 = vunpack.c.0.s8 %v651_v57  ;;  %v637_v8 = vsub.s32 0, %v636_v31  ;;  %v641_v9 = vsub.s32 1, %v636_v31 }
 0x198   : > { %v630_v61 = vsub.f32 %v628_v55, %v629_v59 }
 0x199   : > { %v655_v63 = vsub.s32 %v652_v60, %v636_v31 }
 0x19a   : > { %v631_v3 = vmax.f32 %v630_v61, 0.0 }
 0x19b   : > { %v680_v5 = vrot.slane %v673_v62, %v655_v63 }
 0x19c   : > { %v632_v4 = vadd.f32 1e-05, %v631_v3 }
 0x19d   : > { %v681_v6 = vcombine.high %v680_v5, %v680_v5 }
 0x19e   : > { %2481 = vrsqrt.f32 %v632_v4 }
 0x19f   : > { %v688_v7 = vrot.slane %v681_v6, %v655_v63 }
 0x1a1   : > { %v690_v10 = vmul.f32 %v688_v7, %v625_v54 }
 0x1ab   : > { %v2482_v11 = vpop.eup %2481 }
 0x1ac   : > { %v638_v12 = vrot.slane %v2482_v11, %v637_v8  ;;  %v642_v13 = vrot.slane %v2482_v11, %v641_v9  ;;  %v691_v14 = vmul.f32 %v2482_v11, %v690_v10 }
 0x1ae   : > { %v645_v15 = vmul.f32 %v638_v12, %v3125_v0  ;;  %v646_v16 = vmul.f32 %v642_v13, %v3127_v1  ;;  %v696_v17 = vrot.slane %v691_v14, %v637_v8  ;;  %v700_v18 = vrot.slane %v691_v14, %v641_v9 }
 0x1b0   : > { %v649_v19 = vcombine.low %v645_v15, %v646_v16  ;;  %v703_v20 = vsub.f32 %v3125_v0, %v696_v17  ;;  %v704_v21 = vsub.f32 %v3127_v1, %v700_v18 }
 0x1b2   : > { %v656_v22 = vrot.slane %v649_v19, %v655_v63  ;;  %v707_v23 = vcombine.low %v703_v20, %v704_v21 }
 0x1b4   : > { %v657_v24 = vcombine.high %v656_v22, %v656_v22  ;;  %v714_v25 = vrot.slane %v707_v23, %v655_v63 }
 0x1b6   : > { %v664_v26 = vrot.slane %v657_v24, %v655_v63  ;;  %v721_v27 = vrot.slane %v714_v25, %v655_v63 }
 0x1b8   : > { %670 = vst.msk [vmem:[#allocation7] ss:$2 sm:$0x3] %vm668_vm2, %v664_v26  ;;  %v722_v28 = vcombine.high %v721_v27, %v721_v27 }
 0x1ba   : > { %725 = vst.msk [vmem:[#allocation7 + $0x1] ss:$2 sm:$0x3] %vm668_vm2, %v722_v28 }
 0x1bb PF: > { %v2483_v29 = vld [vmem:[#allocation12 + $0xf4] ss:$8 sps:$4 sm:$0xff]   ;;  %v2485_v30 = vld [vmem:[#allocation12 + $0xf0] ss:$8 sps:$4 sm:$0xff]   ;;  %v2486_v33 = vld [vmem:[#allocation12 + $0xe4] ss:$8 sps:$4 sm:$0xff]   ;;  %v742_v39 = vlaneseq }
 0x1bc   : > { %993 = vmatprep.subr.bf16.mxu0 %v2483_v29  ;;  %v2488_v34 = vld [vmem:[#allocation12 + $0xe0] ss:$8 sps:$4 sm:$0xff]   ;;  %v2489_v35 = vld [vmem:[#allocation12 + $0xd4] ss:$8 sps:$4 sm:$0xff]   ;;  %v2491_v36 = vld [vmem:[#allocation12 + $0xd0] ss:$8 sps:$4 sm:$0xff]  }
 0x1bd   : > { %994 = vmatpush1.bf16.msra.mxu0 %v2485_v30  ;;  %v2492_v37 = vld [vmem:[#allocation12 + $0xc4] ss:$8 sps:$4 sm:$0xff]   ;;  %v2494_v38 = vld [vmem:[#allocation12 + $0xc0] ss:$8 sps:$4 sm:$0xff]   ;;  %v2495_v40 = vld [vmem:[#allocation12 + $0xb4] ss:$8 sps:$4 sm:$0xff]  }
 0x1be   : > { %995 = vmatprep.subr.bf16.mxu0 %v2486_v33  ;;  %s727_s27 = sshra.s32 %s3123_s10, 3  ;;  %v2497_v41 = vld [vmem:[#allocation12 + $0xb0] ss:$8 sps:$4 sm:$0xff]   ;;  %v3170_v42 = vshrl.u32 %v742_v39, 7  ;;  %v2498_v43 = vld [vmem:[#allocation12 + $0xa4] ss:$8 sps:$4 sm:$0xff]  }
 0x1bf   : > { %s3167_s11 = sshll.u32 %s727_s27, 4  ;;  %v2500_v44 = vld [vmem:[#allocation12 + $0xa0] ss:$8 sps:$4 sm:$0xff]   ;;  %v2501_v46 = vld [vmem:[#allocation12 + $0x94] ss:$8 sps:$4 sm:$0xff]   ;;  %vm1448_vm3 = vcmp.lt.s32.totalorder %v742_v39, 256 }
 0x1c0   : > { %v748_v45 = vsub.s32 1, %v3170_v42  ;;  %s3174_s7 = scalar_lea.vmem [#allocation2], %s3167_s11  ;;  %v740_v49 = vld [vmem:[#allocation7] ss:$2 sm:$0x3]  ;;  %v744_v19 = vsub.s32 0, %v3170_v42 }
 0x1c1   : > { %996 = vmatpush1.bf16.msra.mxu0 %v2488_v34  ;;  %v733_v47 = vld [vmem:[%s3174_s7 + $0x8] sm:$0xff]  ;;  %v735_v48 = vld [vmem:[%s3174_s7 + $0x18] sm:$0xff]  ;;  %v732_v22 = vld [vmem:[%s3174_s7] sm:$0xff]  ;;  %s3210_s21 = scalar_lea.vmem [#allocation3], %s3167_s11 }
 0x1c2   : > { %997 = vmatprep.subr.bf16.mxu0 %v2489_v35  ;;  %v3178_v32 = vld [vmem:[#allocation7 + $0x1] ss:$2 sm:$0x3]  ;;  %v3180_v51 = vrot.slane %v740_v49, %v748_v45  ;;  %v2504_v53 = vld [vmem:[#allocation12 + $0x84] ss:$8 sps:$4 sm:$0xff]   ;;  %v745_v20 = vrot.slane %v740_v49, %v744_v19 }
 0x1c3   : > { %v2503_v50 = vld [vmem:[#allocation12 + $0x90] ss:$8 sps:$4 sm:$0xff]   ;;  %v3183_v52 = vrot.slane %v3178_v32, %v748_v45  ;;  %v2506_v54 = vld [vmem:[#allocation12 + $0x80] ss:$8 sps:$4 sm:$0xff]   ;;  %v2507_v61 = vld [vmem:[#allocation12 + $0x174] ss:$8 sps:$4 sm:$0xff]   ;;  %v766_v27 = vrot.slane %v3178_v32, %v744_v19 }
 0x1c4   : > { %v753_v55 = vmul.f32 %v3180_v51, %v733_v47  ;;  %v755_v31 = vmul.f32 %v3180_v51, %v735_v48  ;;  %v2531_v56 = vld [vmem:[#allocation12 + $0x2f0] ss:$8 sps:$4 sm:$0xff]   ;;  %v2533_v60 = vld [vmem:[#allocation12 + $0x2e0] ss:$8 sps:$4 sm:$0xff]   ;;  %v2510_v7 = vld [vmem:[#allocation12 + $0x164] ss:$8 sps:$4 sm:$0xff]   ;;  %v752_v28 = vmul.f32 %v745_v20, %v732_v22 }
 0x1c5   : > { %998 = vmatpush1.bf16.msra.mxu0 %v2491_v36  ;;  %v2532_v57 = vld [vmem:[#allocation12 + $0x270] ss:$8 sps:$4 sm:$0xff]   ;;  %2200 = vmatprep.subr.bf16.mxu1 %v2531_v56  ;;  %v2534_v4 = vld [vmem:[#allocation12 + $0x260] ss:$8 sps:$4 sm:$0xff]   ;;  %v2513_v9 = vld [vmem:[#allocation12 + $0x154] ss:$8 sps:$4 sm:$0xff]  }
 0x1c6   : > { %999 = vmatprep.subr.bf16.mxu0 %v2492_v37  ;;  %v774_v58 = vadd.f32 %v3183_v52, %v753_v55  ;;  %v776_v59 = vadd.f32 %v3183_v52, %v755_v31  ;;  %v2509_v3 = vld [vmem:[#allocation12 + $0x170] ss:$8 sps:$4 sm:$0xff]   ;;  %2201 = vmatpush3.bf16.msra.mxu1 %v2532_v57  ;;  %v2512_v8 = vld [vmem:[#allocation12 + $0x160] ss:$8 sps:$4 sm:$0xff]   ;;  %v2516_v15 = vld [vmem:[#allocation12 + $0x144] ss:$8 sps:$4 sm:$0xff]   ;;  %v773_v36 = vadd.f32 %v766_v27, %v752_v28 }
 0x1c7   : > { %2202 = vmatprep.subr.bf16.mxu1 %v2533_v60  ;;  %v2535_v6 = vld [vmem:[#allocation12 + $0x2d0] ss:$8 sps:$4 sm:$0xff]   ;;  %v2537_v11 = vld [vmem:[#allocation12 + $0x2c0] ss:$8 sps:$4 sm:$0xff]   ;;  %v2519_v18 = vld [vmem:[#allocation12 + $0x134] ss:$8 sps:$4 sm:$0xff]  }
 0x1c8   : > { %v782_v62 = vmax.f32 %v774_v58, 0.0  ;;  %v784_v63 = vmax.f32 %v776_v59, 0.0  ;;  %v2536_v10 = vld [vmem:[#allocation12 + $0x250] ss:$8 sps:$4 sm:$0xff]   ;;  %v2538_v12 = vld [vmem:[#allocation12 + $0x240] ss:$8 sps:$4 sm:$0xff]  }
 0x1c9   : > { %1000 = vmatpush1.bf16.msra.mxu0 %v2494_v38  ;;  %v2515_v13 = vld [vmem:[#allocation12 + $0x150] ss:$8 sps:$4 sm:$0xff]   ;;  %v2518_v17 = vld [vmem:[#allocation12 + $0x140] ss:$8 sps:$4 sm:$0xff]   ;;  %v2522_v24 = vld [vmem:[#allocation12 + $0x124] ss:$8 sps:$4 sm:$0xff]  }
 0x1ca   : > { %1001 = vmatprep.subr.bf16.mxu0 %v2495_v40  ;;  %v822_v5 = vpack.c.bf16 %v784_v63, %v782_v62  ;;  %2203 = vmatpush3.bf16.msra.mxu1 %v2534_v4  ;;  %v2539_v14 = vld [vmem:[#allocation12 + $0x2b0] ss:$8 sps:$4 sm:$0xff]   ;;  %v734_v23 = vld [vmem:[%s3174_s7 + $0x10] sm:$0xff]  ;;  %v739_v26 = vld [vmem:[%s3174_s7 + $0x38] sm:$0xff]  ;;  %v827_v4 = vsub.s32 3, %v3170_v42 }
 0x1cb   : > { %2204 = vmatprep.subr.bf16.mxu1 %v2535_v6  ;;  %v2540_v16 = vld [vmem:[#allocation12 + $0x230] ss:$8 sps:$4 sm:$0xff]   ;;  %v754_v29 = vmul.f32 %v745_v20, %v734_v23  ;;  %v2524_v30 = vld [vmem:[#allocation12 + $0x120] ss:$8 sps:$4 sm:$0xff]   ;;  %v759_v34 = vmul.f32 %v3180_v51, %v739_v26  ;;  %v2525_v35 = vld [vmem:[#allocation12 + $0x114] ss:$8 sps:$4 sm:$0xff]  }
 0x1cc   : > { %1025 = vmatprep.mubr.bf16.mxu0 %v822_v5  ;;  %v2521_v21 = vld [vmem:[#allocation12 + $0x130] ss:$8 sps:$4 sm:$0xff]   ;;  %v2528_v45 = vld [vmem:[#allocation12 + $0x104] ss:$8 sps:$4 sm:$0xff]   ;;  %v2530_v32 = vld [vmem:[#allocation12 + $0x100] ss:$8 sps:$4 sm:$0xff]   ;;  %v832_v6 = vrot.slane %v3127_v1, %v827_v4 }
 0x1cd   : > { %1002 = vmatpush1.bf16.msra.mxu0 %v2497_v41  ;;  %v737_v25 = vld [vmem:[%s3174_s7 + $0x28] sm:$0xff]  ;;  %v775_v37 = vadd.f32 %v766_v27, %v754_v29  ;;  %v780_v41 = vadd.f32 %v3183_v52, %v759_v34  ;;  %v2541_v58 = vld [vmem:[#allocation12 + $0x2a0] ss:$8 sps:$4 sm:$0xff]  }
 0x1ce   : > { %1003 = vmatprep.subr.bf16.mxu0 %v2498_v43  ;;  %2205 = vmatpush3.bf16.msra.mxu1 %v2536_v10  ;;  %v757_v33 = vmul.f32 %v3180_v51, %v737_v25  ;;  %v2527_v38 = vld [vmem:[#allocation12 + $0x110] ss:$8 sps:$4 sm:$0xff]   ;;  %v2542_v59 = vld [vmem:[#allocation12 + $0x220] ss:$8 sps:$4 sm:$0xff]   ;;  %v2552_v25 = vld [vmem:[#allocation12 + $0x1e4] ss:$8 sps:$4 sm:$0xff]  }
 0x1cf   : > { %2206 = vmatprep.subr.bf16.mxu1 %v2537_v11  ;;  %v736_v43 = vld [vmem:[%s3174_s7 + $0x20] sm:$0xff]  ;;  %v783_v47 = vmax.f32 %v775_v37, 0.0  ;;  %v788_v51 = vmax.f32 %v780_v41, 0.0  ;;  %v2545_v62 = vld [vmem:[#allocation12 + $0x280] ss:$8 sps:$4 sm:$0xff]  }
 0x1d0   : > { %v778_v40 = vadd.f32 %v3183_v52, %v757_v33  ;;  %v756_v48 = vmul.f32 %v745_v20, %v736_v43  ;;  %v2543_v60 = vld [vmem:[#allocation12 + $0x290] ss:$8 sps:$4 sm:$0xff]   ;;  %v2546_v63 = vld [vmem:[#allocation12 + $0x200] ss:$8 sps:$4 sm:$0xff]  }
 0x1d1   : > { %1004 = vmatpush1.bf16.msra.mxu0 %v2500_v44  ;;  %v738_v44 = vld [vmem:[%s3174_s7 + $0x30] sm:$0xff]  ;;  %v2547_v22 = vld [vmem:[#allocation12 + $0x1f0] ss:$8 sps:$4 sm:$0xff]  }
 0x1d2   : > { %1005 = vmatprep.subr.bf16.mxu0 %v2501_v46  ;;  %2207 = vmatpush3.bf16.msra.mxu1 %v2538_v12  ;;  %v781_v46 = vmax.f32 %v773_v36, 0.0  ;;  %v758_v49 = vmul.f32 %v745_v20, %v738_v44  ;;  %v2550_v33 = vld [vmem:[#allocation12 + $0x1e0] ss:$8 sps:$4 sm:$0xff]   ;;  %v2553_v41 = vld [vmem:[#allocation12 + $0x1d0] ss:$8 sps:$4 sm:$0xff]  }
 0x1d3   : > { %2208 = vmatprep.subr.bf16.mxu1 %v2539_v14  ;;  %v2558_v44 = vld [vmem:[#allocation12 + $0x1c4] ss:$8 sps:$4 sm:$0xff]  }
 0x1d4   : > { %v779_v55 = vadd.f32 %v766_v27, %v758_v49  ;;  %v2562_v49 = vld [vmem:[#allocation12 + $0x1a0] ss:$8 sps:$4 sm:$0xff]  }
 0x1d5   : > { %1006 = vmatpush1.bf16.msra.mxu0 %v2503_v50  ;;  %v786_v50 = vmax.f32 %v778_v40, 0.0 }
 0x1d6   : > { %1007 = vmatprep.subr.bf16.mxu0 %v2504_v53  ;;  %2209 = vmatpush3.bf16.msra.mxu1 %v2540_v16  ;;  %v821_v53 = vpack.c.bf16 %v783_v47, %v781_v46  ;;  %v787_v56 = vmax.f32 %v779_v55, 0.0  ;;  %v2561_v46 = vld [vmem:[#allocation12 + $0x1b4] ss:$8 sps:$4 sm:$0xff]   ;;  %v2559_v47 = vld [vmem:[#allocation12 + $0x1b0] ss:$8 sps:$4 sm:$0xff]  }
 0x1d7   : > { %v824_v31 = vpack.c.bf16 %v788_v51, %v786_v50  ;;  %2210 = vmatprep.subr.bf16.mxu1 %v2541_v58  ;;  %v2565_v50 = vld [vmem:[#allocation12 + $0x190] ss:$8 sps:$4 sm:$0xff]   ;;  %v2570_v51 = vld [vmem:[#allocation12 + $0x184] ss:$8 sps:$4 sm:$0xff]  }
 0x1d9   : > { %1008 = vmatpush1.bf16.msra.mxu0 %v2506_v54  ;;  %v777_v54 = vadd.f32 %v766_v27, %v756_v48  ;;  %v2564_v48 = vld [vmem:[#allocation12 + $0x1a4] ss:$8 sps:$4 sm:$0xff]  }
 0x1da   : > { %1009 = vmatprep.subr.bf16.mxu0 %v2507_v61  ;;  %2211 = vmatpush3.bf16.msra.mxu1 %v2542_v59  ;;  %v2544_v61 = vld [vmem:[#allocation12 + $0x210] ss:$8 sps:$4 sm:$0xff]  }
 0x1db   : > { %v785_v52 = vmax.f32 %v777_v54, 0.0  ;;  %2212 = vmatprep.subr.bf16.mxu1 %v2543_v60  ;;  %v2862_v54 = vmov 0  }
 0x1dd   : > { %1010 = vmatpush2.bf16.msra.mxu0 %v2509_v3  ;;  %v823_v57 = vpack.c.bf16 %v787_v56, %v785_v52  ;;  %v2549_v3 = vld [vmem:[#allocation12 + $0x1f4] ss:$8 sps:$4 sm:$0xff]  }
 0x1de   : > { %1011 = vmatprep.subr.bf16.mxu0 %v2510_v7  ;;  %2213 = vmatpush3.bf16.msra.mxu1 %v2544_v61  ;;  %v828_v7 = vrot.slane %v3125_v0, %v827_v4 }
 0x1df   : > { %2214 = vmatprep.subr.bf16.mxu1 %v2545_v62 }
 0x1e1   : > { %1012 = vmatpush2.bf16.msra.mxu0 %v2512_v8 }
 0x1e2   : > { %1013 = vmatprep.subr.bf16.mxu0 %v2513_v9  ;;  %2215 = vmatpush3.bf16.msra.mxu1 %v2546_v63 }
 0x1e3   : > { %1345 = vmatprep.subr.bf16.mxu1 %v2549_v3 }
 0x1e5   : > { %1014 = vmatpush2.bf16.msra.mxu0 %v2515_v13 }
 0x1e6   : > { %1015 = vmatprep.subr.bf16.mxu0 %v2516_v15 }
 0x1e9   : > { %1016 = vmatpush2.bf16.msra.mxu0 %v2518_v17 }
 0x1ea   : > { %1017 = vmatprep.subr.bf16.mxu0 %v2519_v18 }
 0x1ed   : > { %1018 = vmatpush2.bf16.msra.mxu0 %v2521_v21 }
 0x1ee   : > { %1019 = vmatprep.subr.bf16.mxu0 %v2522_v24 }
 0x1f1   : > { %1020 = vmatpush2.bf16.msra.mxu0 %v2524_v30 }
 0x1f2   : > { %1021 = vmatprep.subr.bf16.mxu0 %v2525_v35  ;;  %v2555_v35 = vld [vmem:[#allocation12 + $0x1d4] ss:$8 sps:$4 sm:$0xff]  }
 0x1f5   : > { %1022 = vmatpush2.bf16.msra.mxu0 %v2527_v38 }
 0x1f6   : > { %1023 = vmatprep.subr.bf16.mxu0 %v2528_v45  ;;  %v2556_v45 = vld [vmem:[#allocation12 + $0x1c0] ss:$8 sps:$4 sm:$0xff]  }
 0x1f9   : > { %1024 = vmatpush2.bf16.msra.mxu0 %v2530_v32  ;;  %v2567_v32 = vld [vmem:[#allocation12 + $0x194] ss:$8 sps:$4 sm:$0xff]  }
 0x1fc   : > { %1026 = vmatmul.mubr.bf16.vlgmr.msra.gmra.mxu0 %v821_v53  ;;  %v2568_v53 = vld [vmem:[#allocation12 + $0x180] ss:$8 sps:$4 sm:$0xff]  }
 0x1fd   : > { %1035 = vmatprep.mubr.bf16.mxu0 %v824_v31  ;;  %v1092_v31 = vsub.s32 4, %v3170_v42 }
 0x204   : > { %1036 = vmatmul.mubr.bf16.gmra.mxu0 %v823_v57  ;;  %v1093_v57 = vrot.slane %v3125_v0, %v1092_v31 }
 0x2bc   : > { %v1027_v5 = vpop.f32.mrf.mxu0 }
 0x2bd   : > { %v1028_v12 = vadd.f32 %v1027_v5, %v828_v7 }
 0x2be   : > { %v1029_v8 = vpop.f32.mrf.mxu0 }
 0x2bf   : > { %v1030_v10 = vadd.f32 %v1029_v8, %v832_v6  ;;  %v1046_v19 = vmax.f32 %v1028_v12, 0.0  ;;  %v1259_v12 = vsub.s32 5, %v3170_v42 }
 0x2c0   : > { %v1031_v9 = vpop.f32.mrf.mxu0 }
 0x2c1   : > { %v1032_v11 = vadd.f32 %v1031_v9, %v828_v7  ;;  %v1047_v17 = vmax.f32 %v1030_v10, 0.0 }
 0x2c2   : > { %v1033_v13 = vpop.f32.mrf.mxu0 }
 0x2c3   : > { %v1034_v14 = vadd.f32 %v1033_v13, %v832_v6  ;;  %v1048_v15 = vmax.f32 %v1032_v11, 0.0  ;;  %v1260_v13 = vrot.slane %v3125_v0, %v1259_v12 }
 0x2c4   : > { %v1037_v16 = vpop.f32.mrf.mxu0 }
 0x2c5   : > { %v1049_v18 = vmax.f32 %v1034_v14, 0.0  ;;  %v1086_v23 = vpack.c.bf16 %v1048_v15, %v1046_v19  ;;  %v1038_v28 = vadd.f32 %v1037_v16, %v828_v7  ;;  %v1264_v14 = vrot.slane %v3127_v1, %v1259_v12 }
 0x2c6   : > { %v1039_v20 = vpop.f32.mrf.mxu0 }
 0x2c7   : > { %v1087_v21 = vpack.c.bf16 %v1049_v18, %v1047_v17  ;;  %v1040_v26 = vadd.f32 %v1039_v20, %v832_v6  ;;  %v1050_v38 = vmax.f32 %v1038_v28, 0.0 }
 0x2c8   : > { %v1041_v24 = vpop.f32.mrf.mxu0 }
 0x2c9   : > { %v1042_v27 = vadd.f32 %v1041_v24, %v828_v7  ;;  %1222 = vmatprep.mubr.bf16.mxu1 %v1087_v21  ;;  %v1051_v36 = vmax.f32 %v1040_v26, 0.0 }
 0x2ca   : > { %v1043_v29 = vpop.f32.mrf.mxu0  ;;  %1223 = vmatmul.mubr.bf16.vlgmr.msra.gmra.mxu1 %v1086_v23 }
 0x2cb   : > { %v1044_v30 = vadd.f32 %v1043_v29, %v832_v6  ;;  %1346 = vmatpush1.bf16.msra.mxu1 %v2547_v22  ;;  %v1052_v34 = vmax.f32 %v1042_v27, 0.0 }
 0x2cc   : > { %1347 = vmatprep.subr.bf16.mxu1 %v2552_v25 }
 0x2cd   : > { %v1053_v37 = vmax.f32 %v1044_v30, 0.0  ;;  %v1088_v43 = vpack.c.bf16 %v1052_v34, %v1050_v38 }
 0x2cf   : > { %v1089_v40 = vpack.c.bf16 %v1053_v37, %v1051_v36  ;;  %1348 = vmatpush1.bf16.msra.mxu1 %v2550_v33 }
 0x2d0   : > { %1349 = vmatprep.subr.bf16.mxu1 %v2555_v35 }
 0x2d1   : > { %1230 = vmatprep.mubr.bf16.mxu1 %v1089_v40 }
 0x2d2   : > { %1231 = vmatmul.mubr.bf16.gmra.mxu1 %v1088_v43 }
 0x2d3   : > { %1350 = vmatpush1.bf16.msra.mxu1 %v2553_v41  ;;  %1377 = vmatprep.mubr.bf16.mxu1 %v2862_v54 }
 0x2d4   : > { %1351 = vmatprep.subr.bf16.mxu1 %v2558_v44 }
 0x2d7   : > { %1352 = vmatpush1.bf16.msra.mxu1 %v2556_v45 }
 0x2d8   : > { %1353 = vmatprep.subr.bf16.mxu1 %v2561_v46 }
 0x2db   : > { %1354 = vmatpush1.bf16.msra.mxu1 %v2559_v47 }
 0x2dc   : > { %1355 = vmatprep.subr.bf16.mxu1 %v2564_v48 }
 0x2df   : > { %1356 = vmatpush1.bf16.msra.mxu1 %v2562_v49 }
 0x2e0   : > { %1357 = vmatprep.subr.bf16.mxu1 %v2567_v32 }
 0x2e3   : > { %1358 = vmatpush1.bf16.msra.mxu1 %v2565_v50 }
 0x2e4   : > { %1359 = vmatprep.subr.bf16.mxu1 %v2570_v51 }
 0x2e7   : > { %1360 = vmatpush1.bf16.msra.mxu1 %v2568_v53 }
 0x38a   : > { %v2216_v55 = vpop.f32.mrf.mxu1 }
 0x38c   : > { %v2217_v52 = vpop.f32.mrf.mxu1 }
 0x38d   : > { %v2218_v58 = vadd.f32 %v2217_v52, %v2216_v55 }
 0x38e   : > { %v2219_v56 = vpop.f32.mrf.mxu1 }
 0x38f   : > { %v1225_v62 = vadd.f32 %v2218_v58, %v1093_v57 }
 0x390   : > { %v2220_v59 = vpop.f32.mrf.mxu1 }
 0x391   : > { %v2221_v60 = vadd.f32 %v2220_v59, %v2219_v56 }
 0x392   : > { %v2222_v61 = vpop.f32.mrf.mxu1 }
 0x393   : > { %v1228_v63 = vadd.f32 %v2221_v60, %v1093_v57 }
 0x394   : > { %v2223_v3 = vpop.f32.mrf.mxu1 }
 0x395   : > { %v1255_v4 = vpack.c.bf16 %v1228_v63, %v1225_v62  ;;  %v2224_v6 = vadd.f32 %v2223_v3, %v2222_v61 }
 0x396   : > { %v2225_v5 = vpop.f32.mrf.mxu1 }
 0x397   : > { %1378 = vmatmul.mubr.bf16.vlgmr.msra.gmra.mxu1 %v1255_v4  ;;  %v1233_v9 = vadd.f32 %v2224_v6, %v1093_v57 }
 0x398   : > { %v2226_v7 = vpop.f32.mrf.mxu1  ;;  %1387 = vmatprep.mubr.bf16.mxu1 %v2862_v54 }
 0x399   : > { %v2227_v8 = vadd.f32 %v2226_v7, %v2225_v5 }
 0x39b   : > { %v1236_v10 = vadd.f32 %v2227_v8, %v1093_v57  ;;  %v2863_v57 = vmov 1966171168  }
 0x39c   : > { %v1431_v58 = vunpack.c.l.s4 %v2863_v57 }
 0x39d   : > { %v1256_v11 = vpack.c.bf16 %v1236_v10, %v1233_v9 }
 0x39e   : > { %v1432_v6 = vunpack.c.0.s8 %v1431_v58 }
 0x39f   : > { %1388 = vmatmul.mubr.bf16.gmra.mxu1 %v1256_v11 }
 0x457   : > { %v1379_v15 = vpop.f32.mrf.mxu1 }
 0x458   : > { %v1380_v16 = vadd.f32 %v1379_v15, %v1260_v13 }
 0x459   : > { %v1381_v17 = vpop.f32.mrf.mxu1 }
 0x45a   : > { %1400 = vst [vmem:[%s3210_s21] sm:$0xff] %v1380_v16  ;;  %v1382_v18 = vadd.f32 %v1381_v17, %v1264_v14  ;;  %v1453_v26 = vmul.f32 %v1380_v16, %v1380_v16 }
 0x45b   : > { %v1383_v19 = vpop.f32.mrf.mxu1 }
 0x45c   : > { %1401 = vst [vmem:[%s3210_s21 + $0x8] sm:$0xff] %v1382_v18  ;;  %v1384_v20 = vadd.f32 %v1383_v19, %v1260_v13  ;;  %v1454_v34 = vmul.f32 %v1382_v18, %v1382_v18 }
 0x45d   : > { %v1385_v21 = vpop.f32.mrf.mxu1 }
 0x45e   : > { %1402 = vst [vmem:[%s3210_s21 + $0x10] sm:$0xff] %v1384_v20  ;;  %v1386_v22 = vadd.f32 %v1385_v21, %v1264_v14  ;;  %v1455_v23 = vmul.f32 %v1384_v20, %v1384_v20  ;;  %v1409_v29 = vadd.f32 %v1384_v20, %v1380_v16  ;;  %v1435_v16 = vsub.s32 %v1432_v6, %v3170_v42 }
 0x45f   : > { %v1389_v24 = vpop.f32.mrf.mxu1 }
 0x460   : > { %1403 = vst [vmem:[%s3210_s21 + $0x18] sm:$0xff] %v1386_v22  ;;  %v1390_v25 = vadd.f32 %v1389_v24, %v1260_v13  ;;  %v1456_v27 = vmul.f32 %v1386_v22, %v1386_v22  ;;  %v1461_v35 = vadd.f32 %v1455_v23, %v1453_v26  ;;  %v1418_v37 = vadd.f32 %v1386_v22, %v1382_v18  ;;  %v1408_v23 = vld [vmem:[#allocation6] ss:$2 sm:$0x3] }
 0x461   : > { %v1391_v28 = vpop.f32.mrf.mxu1  ;;  %v1452_v26 = vld [vmem:[#allocation6 + $0x1] ss:$2 sm:$0x3] }
 0x462   : > { %1404 = vst [vmem:[%s3210_s21 + $0x20] sm:$0xff] %v1390_v25  ;;  %v1457_v30 = vmul.f32 %v1390_v25, %v1390_v25  ;;  %v1392_v33 = vadd.f32 %v1391_v28, %v1264_v14  ;;  %v1410_v38 = vadd.f32 %v1409_v29, %v1390_v25  ;;  %v1470_v43 = vadd.f32 %v1456_v27, %v1454_v34 }
 0x463   : > { %v1393_v36 = vpop.f32.mrf.mxu1 }
 0x464   : > { %1405 = vst [vmem:[%s3210_s21 + $0x28] sm:$0xff] %v1392_v33  ;;  %v1458_v40 = vmul.f32 %v1392_v33, %v1392_v33  ;;  %v1394_v41 = vadd.f32 %v1393_v36, %v1260_v13  ;;  %v1462_v44 = vadd.f32 %v1461_v35, %v1457_v30  ;;  %v1419_v46 = vadd.f32 %v1418_v37, %v1392_v33 }
 0x465   : > { %v1395_v45 = vpop.f32.mrf.mxu1 }
 0x466   : > { %1406 = vst [vmem:[%s3210_s21 + $0x30] sm:$0xff] %v1394_v41  ;;  %v1411_v47 = vadd.f32 %v1410_v38, %v1394_v41  ;;  %v1459_v48 = vmul.f32 %v1394_v41, %v1394_v41  ;;  %v1396_v49 = vadd.f32 %v1395_v45, %v1264_v14  ;;  %v1471_v32 = vadd.f32 %v1470_v43, %v1458_v40 }
 0x468   : > { %v1412_v50 = vrot.slane %v1411_v47, 4  ;;  %v1463_v51 = vadd.f32 %v1462_v44, %v1459_v48  ;;  %1407 = vst [vmem:[%s3210_s21 + $0x38] sm:$0xff] %v1396_v49  ;;  %v1420_v53 = vadd.f32 %v1419_v46, %v1396_v49  ;;  %v1460_v54 = vmul.f32 %v1396_v49, %v1396_v49 }
 0x46a   : > { %v1413_v55 = vadd.f32 %v1412_v50, %v1411_v47  ;;  %v1464_v31 = vrot.slane %v1463_v51, 4  ;;  %v1421_v52 = vrot.slane %v1420_v53, 4  ;;  %v1472_v56 = vadd.f32 %v1471_v32, %v1460_v54 }
 0x46c   : > { %v1414_v59 = vrot.slane %v1413_v55, 2  ;;  %v1465_v60 = vadd.f32 %v1464_v31, %v1463_v51  ;;  %v1422_v61 = vadd.f32 %v1421_v52, %v1420_v53  ;;  %v1473_v62 = vrot.slane %v1472_v56, 4 }
 0x46e   : > { %v1415_v63 = vadd.f32 %v1414_v59, %v1413_v55  ;;  %v1466_v3 = vrot.slane %v1465_v60, 2  ;;  %v1423_v4 = vrot.slane %v1422_v61, 2  ;;  %v1474_v5 = vadd.f32 %v1473_v62, %v1472_v56 }
 0x470   : > { %v1416_v7 = vrot.slane %v1415_v63, 1  ;;  %v1467_v8 = vadd.f32 %v1466_v3, %v1465_v60  ;;  %v1424_v9 = vadd.f32 %v1423_v4, %v1422_v61  ;;  %v1475_v10 = vrot.slane %v1474_v5, 2 }
 0x472   : > { %v1468_v11 = vrot.slane %v1467_v8, 1  ;;  %v1425_v12 = vrot.slane %v1424_v9, 1  ;;  %v1476_v13 = vadd.f32 %v1475_v10, %v1474_v5  ;;  %v1417_v14 = vadd.f32 %v1416_v7, %v1415_v63 }
 0x474   : > { %v1426_v15 = vadd.f32 %v1425_v12, %v1424_v9  ;;  %v1477_v17 = vrot.slane %v1476_v13, 1  ;;  %v1469_v18 = vadd.f32 %v1468_v11, %v1467_v8 }
 0x476   : > { %v1429_v19 = vcombine.low %v1417_v14, %v1426_v15  ;;  %v1478_v20 = vadd.f32 %v1477_v17, %v1476_v13 }
 0x478   : > { %v1436_v21 = vrot.slane %v1429_v19, %v1435_v16  ;;  %v1481_v22 = vcombine.low %v1469_v18, %v1478_v20 }
 0x47a   : > { %v1443_v24 = vrot.slane %v1436_v21, %v1435_v16  ;;  %v1488_v25 = vrot.slane %v1481_v22, %v1435_v16 }
 0x47c   : > { %v1445_v27 = vadd.f32 %v1443_v24, %v1408_v23  ;;  %v1495_v28 = vrot.slane %v1488_v25, %v1435_v16 }
 0x47e   : > { %1450 = vst.msk [vmem:[#allocation6] ss:$2 sm:$0x3] %vm1448_vm3, %v1445_v27  ;;  %v1497_v29 = vadd.f32 %v1495_v28, %v1452_v26 }
 0x480   : > { %1498 = vst.msk [vmem:[#allocation6 + $0x1] ss:$2 sm:$0x3] %vm1448_vm3, %v1497_v29 }
 0x481 PF: > { %p2161_p13 = scmp.ne.s32.totalorder %s2835_s25, 2 }
 0x482   : > { %p2162_p0 = scmp.ne.s32.totalorder (!%p2161_p13), %s2831_s24, 0 }
 0x483   : > { %1502 = sbr.rel (%p2161_p13) target bundleno = 1444 (0x5a4), region = 64 }
 0x488   : > { %1506 = sbr.rel (%p2162_p0) target bundleno = 1207 (0x4b7), region = 68 }
 0x48d   : > { %v1507_v42 = vld [vmem:[#allocation6] ss:$2 sm:$0x3]  ;;  %v1510_v30 = vld [vmem:[#allocation6 + $0x1] ss:$2 sm:$0x3]  ;;  %v1518_v33 = vlaneseq  ;;  %v1556_v43 = vcombine.high %v3125_v0, %v3127_v1 }
 0x48e   : > { %v1508_v34 = vmul.f32 0.015625, %v1507_v42  ;;  %v1511_v35 = vmul.f32 0.015625, %v1510_v30  ;;  %v2864_v39 = vmov 1966171168  }
 0x48f   : > { %v1519_v36 = vshrl.u32 %v1518_v33, 7  ;;  %v1534_v37 = vunpack.c.l.s4 %v2864_v39  ;;  %vm1551_vm4 = vcmp.lt.s32.totalorder %v1518_v33, 256 }
 0x490   : > { %v1512_v38 = vmul.f32 %v1508_v34, %v1508_v34 }
 0x491   : > { %v1535_v40 = vunpack.c.0.s8 %v1534_v37  ;;  %v1520_v50 = vsub.s32 0, %v1519_v36  ;;  %v1524_v51 = vsub.s32 1, %v1519_v36 }
 0x492   : > { %v1513_v41 = vsub.f32 %v1511_v35, %v1512_v38 }
 0x493   : > { %v1538_v44 = vsub.s32 %v1535_v40, %v1519_v36 }
 0x494   : > { %v1514_v45 = vmax.f32 %v1513_v41, 0.0 }
 0x495   : > { %v1563_v47 = vrot.slane %v1556_v43, %v1538_v44 }
 0x496   : > { %v1515_v46 = vadd.f32 1e-05, %v1514_v45 }
 0x497   : > { %v1570_v48 = vrot.slane %v1563_v47, %v1538_v44 }
 0x498   : > { %2571 = vrsqrt.f32 %v1515_v46 }
 0x499   : > { %v1571_v49 = vcombine.high %v1570_v48, %v1570_v48 }
 0x49b   : > { %v1573_v32 = vmul.f32 %v1571_v49, %v1508_v34 }
 0x4a5   : > { %v2572_v53 = vpop.eup %2571 }
 0x4a6   : > { %v1521_v54 = vrot.slane %v2572_v53, %v1520_v50  ;;  %v1525_v55 = vrot.slane %v2572_v53, %v1524_v51  ;;  %v1574_v31 = vmul.f32 %v2572_v53, %v1573_v32 }
 0x4a8   : > { %v1528_v52 = vmul.f32 %v1521_v54, %v3125_v0  ;;  %v1529_v56 = vmul.f32 %v1525_v55, %v3127_v1  ;;  %v1579_v57 = vrot.slane %v1574_v31, %v1520_v50  ;;  %v1583_v58 = vrot.slane %v1574_v31, %v1524_v51 }
 0x4aa   : > { %v1532_v59 = vcombine.high %v1528_v52, %v1529_v56  ;;  %v1586_v60 = vsub.f32 %v3125_v0, %v1579_v57  ;;  %v1587_v61 = vsub.f32 %v3127_v1, %v1583_v58 }
 0x4ac   : > { %v1539_v62 = vrot.slane %v1532_v59, %v1538_v44  ;;  %v1590_v63 = vcombine.high %v1586_v60, %v1587_v61 }
 0x4ae   : > { %v1546_v3 = vrot.slane %v1539_v62, %v1538_v44  ;;  %v1597_v4 = vrot.slane %v1590_v63, %v1538_v44 }
 0x4b0   : > { %v1547_v5 = vcombine.high %v1546_v3, %v1546_v3  ;;  %v1598_v6 = vcombine.high %v1597_v4, %v1597_v4 }
 0x4b2   : > { %1553 = vst.msk [vmem:[#allocation8] ss:$2 sm:$0x3] %vm1551_vm4, %v1547_v5  ;;  %v1605_v7 = vrot.slane %v1598_v6, %v1538_v44 }
 0x4b4   : > { %v1606_v8 = vcombine.high %v1605_v7, %v1605_v7 }
 0x4b6   : > { %1609 = vst.msk [vmem:[#allocation8 + $0x1] ss:$2 sm:$0x3] %vm1551_vm4, %v1606_v8 }
 0x4b7 PF: > { %v2573_v9 = vld [vmem:[#allocation12 + $0x2f4] ss:$8 sps:$4 sm:$0xff]   ;;  %v2575_v11 = vld [vmem:[#allocation12 + $0x2e4] ss:$8 sps:$4 sm:$0xff]   ;;  %v1625_v16 = vlaneseq  ;;  %s1610_s14 = sshra.s32 %s3123_s10, 3 }
 0x4b8   : > { %v2574_v10 = vld [vmem:[#allocation12 + $0x274] ss:$8 sps:$4 sm:$0xff]   ;;  %2228 = vmatprep.subr.bf16.mxu0 %v2573_v9  ;;  %2272 = vmatprep.subr.bf16.mxu1 %v2573_v9  ;;  %v2576_v0 = vld [vmem:[#allocation12 + $0x264] ss:$8 sps:$4 sm:$0xff]   ;;  %s2196_s15 = sshll.u32 %s1610_s14, 4 }
 0x4b9   : > { %2229 = vmatpush3.bf16.msra.mxu0 %v2574_v10  ;;  %2280 = vmatpush3.bf16.msra.mxu1 %v2574_v10  ;;  %v2577_v1 = vld [vmem:[#allocation12 + $0x2d4] ss:$8 sps:$4 sm:$0xff]   ;;  %v2579_v13 = vld [vmem:[#allocation12 + $0x2c4] ss:$8 sps:$4 sm:$0xff]   ;;  %v1626_v19 = vshrl.u32 %v1625_v16, 7  ;;  %s1614_s29 = scalar_lea.vmem [#allocation3], %s2196_s15 }
 0x4ba   : > { %2230 = vmatprep.subr.bf16.mxu0 %v2575_v11  ;;  %2273 = vmatprep.subr.bf16.mxu1 %v2575_v11  ;;  %v2578_v12 = vld [vmem:[#allocation12 + $0x254] ss:$8 sps:$4 sm:$0xff]   ;;  %v2580_v14 = vld [vmem:[#allocation12 + $0x244] ss:$8 sps:$4 sm:$0xff]  }
 0x4bb   : > { %v2581_v15 = vld [vmem:[#allocation12 + $0x2b4] ss:$8 sps:$4 sm:$0xff]   ;;  %v2583_v18 = vld [vmem:[#allocation12 + $0x2a4] ss:$8 sps:$4 sm:$0xff]   ;;  %v3231_v23 = vsub.s32 0, %v1626_v19  ;;  %v1631_v24 = vsub.s32 1, %v1626_v19 }
 0x4bc   : > { %v2582_v17 = vld [vmem:[#allocation12 + $0x234] ss:$8 sps:$4 sm:$0xff]   ;;  %v2584_v20 = vld [vmem:[#allocation12 + $0x224] ss:$8 sps:$4 sm:$0xff]  }
 0x4bd   : > { %2231 = vmatpush3.bf16.msra.mxu0 %v2576_v0  ;;  %2281 = vmatpush3.bf16.msra.mxu1 %v2576_v0  ;;  %v1623_v21 = vld [vmem:[#allocation8] ss:$2 sm:$0x3]  ;;  %v1644_v25 = vld [vmem:[#allocation8 + $0x1] ss:$2 sm:$0x3]  ;;  %v1711_v10 = vrot.slane %v3129_v2, %v3231_v23 }
 0x4be   : > { %2232 = vmatprep.subr.bf16.mxu0 %v2577_v1  ;;  %2274 = vmatprep.subr.bf16.mxu1 %v2577_v1  ;;  %v2585_v22 = vld [vmem:[#allocation12 + $0x294] ss:$8 sps:$4 sm:$0xff]   ;;  %v1618_v27 = vld [vmem:[%s1614_s29 + $0x18] sm:$0xff]  ;;  %v1628_v29 = vrot.slane %v1623_v21, %v3231_v23  ;;  %v1632_v42 = vrot.slane %v1623_v21, %v1631_v24  ;;  %v1617_v34 = vld [vmem:[%s1614_s29 + $0x10] sm:$0xff]  ;;  %v1649_v35 = vrot.slane %v1644_v25, %v3231_v23 }
 0x4bf   : > { %v1616_v26 = vld [vmem:[%s1614_s29 + $0x8] sm:$0xff]  ;;  %v1622_v30 = vld [vmem:[%s1614_s29 + $0x38] sm:$0xff]  ;;  %v1615_v33 = vld [vmem:[%s1614_s29] sm:$0xff]  ;;  %v1653_v36 = vrot.slane %v1644_v25, %v1631_v24 }
 0x4c0   : > { %v1620_v28 = vld [vmem:[%s1614_s29 + $0x28] sm:$0xff]  ;;  %v1619_v39 = vld [vmem:[%s1614_s29 + $0x20] sm:$0xff]  ;;  %v1636_v37 = vmul.f32 %v1632_v42, %v1616_v26  ;;  %v1638_v38 = vmul.f32 %v1632_v42, %v1618_v27  ;;  %v1642_v41 = vmul.f32 %v1632_v42, %v1622_v30  ;;  %v1621_v43 = vld [vmem:[%s1614_s29 + $0x30] sm:$0xff]  ;;  %v1635_v45 = vmul.f32 %v1628_v29, %v1615_v33 }
 0x4c1   : > { %2233 = vmatpush3.bf16.msra.mxu0 %v2578_v12  ;;  %2282 = vmatpush3.bf16.msra.mxu1 %v2578_v12  ;;  %v1640_v40 = vmul.f32 %v1632_v42, %v1620_v28  ;;  %v2586_v44 = vld [vmem:[#allocation12 + $0x214] ss:$8 sps:$4 sm:$0xff]   ;;  %v1637_v46 = vmul.f32 %v1628_v29, %v1617_v34  ;;  %v1639_v47 = vmul.f32 %v1628_v29, %v1619_v39  ;;  %v2587_v48 = vld [vmem:[#allocation12 + $0x284] ss:$8 sps:$4 sm:$0xff]  }
 0x4c2   : > { %2234 = vmatprep.subr.bf16.mxu0 %v2579_v13  ;;  %2275 = vmatprep.subr.bf16.mxu1 %v2579_v13  ;;  %v1657_v49 = vadd.f32 %v1653_v36, %v1636_v37  ;;  %v1659_v32 = vadd.f32 %v1653_v36, %v1638_v38  ;;  %v1663_v51 = vadd.f32 %v1653_v36, %v1642_v41  ;;  %v2588_v58 = vld [vmem:[#allocation12 + $0x204] ss:$8 sps:$4 sm:$0xff]  }
 0x4c3   : > { %v1661_v50 = vadd.f32 %v1653_v36, %v1640_v40  ;;  %v1656_v53 = vadd.f32 %v1649_v35, %v1635_v45  ;;  %v1658_v54 = vadd.f32 %v1649_v35, %v1637_v46  ;;  %v1641_v55 = vmul.f32 %v1628_v29, %v1621_v43 }
 0x4c4   : > { %v1665_v31 = vmax.f32 %v1657_v49, 0.0  ;;  %v1667_v52 = vmax.f32 %v1659_v32, 0.0  ;;  %v1660_v57 = vadd.f32 %v1649_v35, %v1639_v47  ;;  %v1671_v59 = vmax.f32 %v1663_v51, 0.0 }
 0x4c5   : > { %2235 = vmatpush3.bf16.msra.mxu0 %v2580_v14  ;;  %2283 = vmatpush3.bf16.msra.mxu1 %v2580_v14  ;;  %v1669_v56 = vmax.f32 %v1661_v50, 0.0  ;;  %v1664_v60 = vmax.f32 %v1656_v53, 0.0  ;;  %v1666_v61 = vmax.f32 %v1658_v54, 0.0  ;;  %v1662_v62 = vadd.f32 %v1649_v35, %v1641_v55 }
 0x4c6   : > { %2236 = vmatprep.subr.bf16.mxu0 %v2581_v15  ;;  %2276 = vmatprep.subr.bf16.mxu1 %v2581_v15  ;;  %v1705_v63 = vpack.c.bf16 %v1667_v52, %v1665_v31  ;;  %v1668_v3 = vmax.f32 %v1660_v57, 0.0 }
 0x4c7   : > { %v1707_v4 = vpack.c.bf16 %v1671_v59, %v1669_v56  ;;  %v1670_v5 = vmax.f32 %v1662_v62, 0.0  ;;  %v1704_v6 = vpack.c.bf16 %v1666_v61, %v1664_v60 }
 0x4c8   : > { %1840 = vmatprep.mubr.bf16.mxu0 %v1705_v63 }
 0x4c9   : > { %2237 = vmatpush3.bf16.msra.mxu0 %v2582_v17  ;;  %2284 = vmatpush3.bf16.msra.mxu1 %v2582_v17  ;;  %v1706_v7 = vpack.c.bf16 %v1670_v5, %v1668_v3 }
 0x4ca   : > { %2238 = vmatprep.subr.bf16.mxu0 %v2583_v18  ;;  %2277 = vmatprep.subr.bf16.mxu1 %v2583_v18 }
 0x4cb   : > { %1848 = vmatprep.mubr.bf16.mxu1 %v1707_v4 }
 0x4cd   : > { %2239 = vmatpush3.bf16.msra.mxu0 %v2584_v20  ;;  %2285 = vmatpush3.bf16.msra.mxu1 %v2584_v20 }
 0x4ce   : > { %2240 = vmatprep.subr.bf16.mxu0 %v2585_v22  ;;  %2278 = vmatprep.subr.bf16.mxu1 %v2585_v22 }
 0x4d1   : > { %2241 = vmatpush3.bf16.msra.mxu0 %v2586_v44  ;;  %2286 = vmatpush3.bf16.msra.mxu1 %v2586_v44 }
 0x4d2   : > { %2242 = vmatprep.subr.bf16.mxu0 %v2587_v48  ;;  %2279 = vmatprep.subr.bf16.mxu1 %v2587_v48 }
 0x4d5   : > { %2243 = vmatpush3.bf16.msra.mxu0 %v2588_v58  ;;  %2287 = vmatpush3.bf16.msra.mxu1 %v2588_v58 }
 0x4d8   : > { %1841 = vmatmul.mubr.bf16.vlgmr.msra.gmra.mxu0 %v1704_v6  ;;  %1849 = vmatmul.mubr.bf16.vlgmr.msra.gmra.mxu1 %v1706_v7 }
 0x598   : > { %v2244_v8 = vpop.f32.mrf.mxu0  ;;  %v2250_v9 = vpop.f32.mrf.mxu1 }
 0x59a   : > { %v2245_v11 = vpop.f32.mrf.mxu0  ;;  %v2251_v0 = vpop.f32.mrf.mxu1 }
 0x59b   : > { %v2246_v1 = vadd.f32 %v2245_v11, %v2244_v8  ;;  %v2252_v12 = vadd.f32 %v2251_v0, %v2250_v9 }
 0x59c   : > { %v2247_v13 = vpop.f32.mrf.mxu0  ;;  %v2253_v14 = vpop.f32.mrf.mxu1 }
 0x59d   : > { %v1843_v15 = vadd.f32 %v2246_v1, %v1711_v10  ;;  %v1851_v16 = vadd.f32 %v2252_v12, %v1711_v10 }
 0x59e   : > { %v2248_v17 = vpop.f32.mrf.mxu0  ;;  %v2254_v18 = vpop.f32.mrf.mxu1 }
 0x59f   : > { %1857 = vst [vmem:[%s3133_s6] sm:$0xff] %v1843_v15  ;;  %1859 = vst [vmem:[%s3133_s6 + $0x10] sm:$0xff] %v1851_v16  ;;  %v2249_v19 = vadd.f32 %v2248_v17, %v2247_v13  ;;  %v2255_v20 = vadd.f32 %v2254_v18, %v2253_v14 }
 0x5a1   : > { %v1846_v21 = vadd.f32 %v2249_v19, %v1711_v10  ;;  %v1854_v22 = vadd.f32 %v2255_v20, %v1711_v10 }
 0x5a3   : > { %1858 = vst [vmem:[%s3133_s6 + $0x8] sm:$0xff] %v1846_v21  ;;  %1860 = vst [vmem:[%s3133_s6 + $0x18] sm:$0xff] %v1854_v22 }
 0x5a4 PF: > { %s2183_s12 = sshll.u32 %s2835_s25, 1  ;;  %s1885_s10 = sshll.u32 %s3131_s5, 4  ;;  %s3244_s10 = int_to_ptr.vmem [resolvable:$true] %s1885_s10 }
 0x5a5   : > { %s1875_s30 = sadd.s32 %s2831_s24, %s2183_s12  ;;  %s1895_s18 = ssub.s32 2, %s2835_s25 }
 0x5a6   : > { %p1876_p4 = scmp.lt.s32.totalorder %s1875_s30, 1  ;;  %s2187_s4 = sshll.u32 %s1895_s18, 1 }
 0x5a7   : > { %s3422_s7 = sld [smem:[#allocation34_spill]]  ;;  %s3253_s14 = ssub.s32 %s2831_s24, %s2187_s4 }
 0x5a8   : > { %s3466_s30 = smov (!%p1876_p4, %s1875_s30), 1  ;;  %s3257_s15 = scalar_lea.sflag [#allocation11], %s288_s2 }
 0x5a9   : > { %s2198_s9 = sshll.u32 %s3466_s30, 10  ;;  %s2669_s5 = scalar_lea.vmem %s3244_s10, 1024 }
 0x5aa   : > { %p2670_p5 = scmp.ne.s32.totalorder %s3244_s10, %s2669_s5  ;;  %s2865_s29 = smov [#allocation15]  }
 0x5ab   : > { %s2673_s12 = sshll.u32 %s2865_s29, 4  ;;  %s2674_s12 = int_to_ptr.vmem [resolvable:$false] %s2673_s12 }
 0x5ac   : > { %p2671_p6 = pnand %p2670_p5, %p2982_p7  ;;  %s2675_s25 = scalar_lea.vmem %s2674_s12, 2048 }
 0x5ad   : > { %s3250_s21 = scalar_lea.hbm %s3422_s7, %s2198_s9  ;;  %p2676_p8 = scmp.lt.s32.totalorder %s3244_s10, %s2674_s12 }
 0x5ae   : > { %p2672_p9 = pneg %p2671_p6  ;;  %p2677_p10 = scmp.lt.s32.totalorder %s2675_s25, %s2669_s5 }
 0x5b0   : > { %p2678_p11 = por %p2677_p10, %p2676_p8 }
 0x5b2   : > { %p2679_p1 = pnand %p2678_p11, %p2672_p9 }
 0x5b4   : > { %2682 = shalt.err (!%p2679_p1)
}
 0x5b5   : > { %s2683_s24 = scalar_lea.hbm %s3250_s21, 1024  ;;  %s2687_s18 = scalar_lea.hbm %s3422_s7, 2048 }
 0x5b6   : > { %p2684_p3 = scmp.ne.s32.totalorder %s3250_s21, %s2683_s24  ;;  %p2688_p13 = scmp.lt.s32.totalorder %s3250_s21, %s3422_s7 }
 0x5b7   : > { %p2689_p0 = scmp.lt.s32.totalorder %s2687_s18, %s2683_s24 }
 0x5b8   : > { %p2685_p12 = pnand %p2684_p3, %p2982_p7 }
 0x5b9   : > { %p2690_p4 = por %p2689_p0, %p2688_p13 }
 0x5ba   : > { %p2686_p2 = pneg %p2685_p12 }
 0x5bc   : > { %p2691_p5 = pnand %p2690_p4, %p2686_p2 }
 0x5be   : > { %2694 = shalt.err (!%p2691_p5)
}
 0x5bf   : > { %s2866_s27 = smov 256   ;;  %s3423_s11 = sld [smem:[#allocation28_spill]] }
 0x5c0   : > { %s2867_s5 = smov 16   ;;  %p1898_p6 = scmp.gt.s32.totalorder %s3253_s14, 0 }
 0x5c1   : > { %2298 = dma.vmem_to_hbm [thread:$0]  (%p2982_p7), %s3244_s10, 1024, %s3250_s21, %s3257_s15, %s2866_s27, %s2866_s27, %s2867_s5  }
 0x5c2   : > { %s1906_s29 = sshll.u32 %s3133_s6, 4  ;;  %s3468_s14 = smov (!%p1898_p6, %s3253_s14), 0  ;;  %s3282_s29 = int_to_ptr.vmem [resolvable:$true] %s1906_s29 }
 0x5c3   : > { %s2199_s12 = sshll.u32 %s3468_s14, 9  ;;  %s3424_s2 = sld [smem:[#allocation35_spill]] }
 0x5c4   : > { %s3292_s18 = scalar_lea.sflag [#allocation17], %s295_s26  ;;  %s2695_s9 = scalar_lea.vmem %s3282_s29, 512 }
 0x5c5   : > { %p2696_p9 = scmp.ne.s32.totalorder %s3282_s29, %s2695_s9  ;;  %p3425_p7 = scmp.ne.s32.totalorder %s3423_s11, 0 }
 0x5c6   : > { %s2868_s6 = smov [#allocation16]  }
 0x5c7   : > { %p2697_p8 = pnand %p2696_p9, %p3425_p7  ;;  %s2699_s3 = sshll.u32 %s2868_s6, 4  ;;  %s2700_s3 = int_to_ptr.vmem [resolvable:$false] %s2699_s3 }
 0x5c8   : > { %s2701_s10 = scalar_lea.vmem %s2700_s3, 1024  ;;  %p2702_p11 = scmp.lt.s32.totalorder %s3282_s29, %s2700_s3 }
 0x5c9   : > { %s3288_s30 = scalar_lea.hbm %s3424_s2, %s2199_s12  ;;  %p2698_p10 = pneg %p2697_p8 }
 0x5ca   : > { %p2703_p1 = scmp.lt.s32.totalorder %s2701_s10, %s2695_s9 }
 0x5cc   : > { %p2704_p3 = por %p2703_p1, %p2702_p11 }
 0x5ce   : > { %p2705_p12 = pnand %p2704_p3, %p2698_p10 }
 0x5d0   : > { %2708 = shalt.err (!%p2705_p12)
}
 0x5d1   : > { %s2709_s26 = scalar_lea.hbm %s3288_s30, 512  ;;  %s2713_s15 = scalar_lea.hbm %s3424_s2, 1024 }
 0x5d2   : > { %p2710_p2 = scmp.ne.s32.totalorder %s3288_s30, %s2709_s26  ;;  %p2714_p4 = scmp.lt.s32.totalorder %s3288_s30, %s3424_s2 }
 0x5d3   : > { %p2715_p5 = scmp.lt.s32.totalorder %s2713_s15, %s2709_s26 }
 0x5d4   : > { %p2711_p13 = pnand %p2710_p2, %p3425_p7 }
 0x5d5   : > { %p2716_p6 = por %p2715_p5, %p2714_p4 }
 0x5d6   : > { %p2712_p0 = pneg %p2711_p13 }
 0x5d8   : > { %p2717_p9 = pnand %p2716_p6, %p2712_p0 }
 0x5da   : > { %2720 = shalt.err (!%p2717_p9)
}
 0x5db   : > { %s2869_s5 = smov 128   ;;  %s2870_s12 = smov 8  }
 0x5dc   : > { %2299 = dma.vmem_to_hbm [thread:$0]  (%p3425_p7), %s3282_s29, 512, %s3288_s30, %s3292_s18, %s2869_s5, %s2869_s5, %s2870_s12  }
 0x5dd PF: > { %s3426_s25 = sld [smem:[#allocation23_spill]]  ;;  %p2325_p8 = scmp.ge.s32.totalorder %s2847_s28, 2 }
 0x5de   : > { %s3427_s24 = sld [smem:[#allocation27_spill]] }
 0x5e3   : > { %s1921_s9 = sand.u32 1, %s3426_s25  }
 0x5e4   : > { %p3428_p10 = scmp.ne.s32.totalorder %s3427_s24, 0  ;;  %s1922_s6 = scalar_lea.sflag [#allocation11], %s1921_s9 }
 0x5e6   : > { %p2314_p11 = pnand %p2325_p8, %p3428_p10 }
 0x5e8   : > { %p2315_p1 = pneg %p2314_p11 }
 0x5ea   : > { %2786 = dma.done.wait (%p2315_p1), %s1922_s6, 1024  }
 0x5eb   : > { %2788 = vsyncadd (%p2315_p1), %s1922_s6, 4294966272  ;;  %s3429_s3 = sld [smem:[#allocation22_spill]] }
 0x5ec   : > { %s3430_s10 = sld [smem:[#allocation29_spill]] }
 0x5f1   : > { %s1930_s26 = sand.u32 1, %s3429_s3  }
 0x5f2   : > { %p3431_p3 = scmp.ne.s32.totalorder %s3430_s10, 0  ;;  %s1931_s11 = scalar_lea.sflag [#allocation17], %s1930_s26 }
 0x5f4   : > { %p2317_p12 = pnand %p2325_p8, %p3431_p3 }
 0x5f6   : > { %p2318_p2 = pneg %p2317_p12 }
 0x5f8   : > { %2790 = dma.done.wait (%p2318_p2), %s1931_s11, 512  }
 0x5f9   : > { %2792 = vsyncadd (%p2318_p2), %s1931_s11, 4294966784  ;;  %s25_s28 = sadd.s32 1, %s2847_s28   ;;  %s3433_s30 = sld [smem:[#allocation31_spill]] }
 0x5fa   : > { %p3323_p7 = scmp.ge.s32.totalorder %s25_s28, 8   ;;  %s3434_s24 = sld [smem:[#allocation24_spill]] }
 0x5fb   : > { %s3435_s25 = sld [smem:[#allocation25_spill]]  ;;  %s3437_s15 = smov %s2799_s16 }
 0x5fc   : > { %s3436_s27 = sld [smem:[#allocation30_spill]]  ;;  %s3438_s16 = smov %s2803_s17 }
 0x5fd   : > { %s3439_s17 = smov %s3094_s1  ;;  %s3440_s18 = smov %s2811_s19 }
 0x5fe   : > { %s3441_s19 = smov %s2815_s20  ;;  %s3442_s20 = smov %s3067_s8 }
 0x5ff   : > { %s3443_s21 = smov %s2823_s22  ;;  %s3444_s22 = smov %s2827_s23 }
 0x600   : > { %s3445_s23 = smov %s3433_s30  ;;  %s3446_s26 = smov %s3448_s13 }
 0x601   :  { %24 = sbr.rel (!%p3323_p7) target bundleno = 18 (0x12), region = 138 }
 0x606   :  { %1936 = vsyncpa [#allocation10], 1 }
 0x607   :  { %1938 = vsyncpa [#allocation10 + $0x1], 1 }
 0x608   :  { %1939 = vsyncpa [#allocation13], 1 }
 0x609   :  { %1940 = vsyncpa [#allocation11], 1 }
 0x60a   :  { %1942 = vsyncpa [#allocation11 + $0x1], 1 }
 0x60b   :  { %1943 = vsyncpa [#allocation17], 1 }
 0x60c   :  { %1945 = vsyncpa [#allocation17 + $0x1], 1 }

</bundles_post_ra>
